<compile_context>
chip_gen: v7x
topology: tpu7x:2x2x1
jax: 0.10.0
libtpu: 0.0.40
codegen_flags: <defaults>
</compile_context>

<pallas_src>
import jax
import jax.numpy as jnp
from jax.experimental import pallas as pl
from jax.experimental.pallas import tpu as pltpu

BN_EPS = 1e-5


# ------------------------------ Pallas kernels ------------------------------

def _conv_stats_kernel(pee_ref, peo_ref, poe_ref, poo_ref, w_ref,
                       conv_ref, stat_ref, pbuf):
    """One image per grid step.

    Inputs:
      pee/peo/poe/poo : (1, Ho+1, Wo+1, Cin) f32  stride-2 phase views of the
                        zero-padded NHWC image (row phase x col phase).
      w_ref           : (16*Cin, Cout) bf16  conv weight, patch columns ordered
                        (kh, kw, cin).
    Outputs:
      conv_ref        : (1, Cout, Ho*Wo) f32  pre-BN conv activations,
                        spatial axis lane-dense.
      stat_ref        : (1, 2, Cout) f32  per-image [sum; sum of squares]
                        (partial BatchNorm statistics).
    Scratch:
      pbuf            : (Ho, Wo, 16*Cin) f32  in-VMEM im2col patch tile.
    """
    Ho, Wo, K = pbuf.shape
    Cin = K // 16
    phases = ((pee_ref, peo_ref), (poe_ref, poo_ref))

    # Assemble the im2col patch tile in VMEM (no 16x HBM materialisation):
    # tap (kh, kw) of the k=4/s=2/p=1 conv is a contiguous (Ho, Wo, Cin) window
    # of the (kh % 2, kw % 2) phase view shifted by (kh // 2, kw // 2).
    for kh in range(4):
        for kw in range(4):
            src = phases[kh % 2][kw % 2]
            ro, co = kh // 2, kw // 2
            tap = kh * 4 + kw
            pbuf[:, :, tap * Cin:(tap + 1) * Cin] = src[0, ro:ro + Ho, co:co + Wo, :]

    # Single MXU matmul for all 16 taps: bf16 operands, f32 accumulation.
    # (Conv bias is omitted: it is exactly cancelled by the BN mean subtraction.)
    p = pbuf[...].reshape(Ho * Wo, K).astype(jnp.bfloat16)
    acc = jnp.dot(p, w_ref[...], preferred_element_type=jnp.float32)  # (Ho*Wo, Cout)

    # Partial BatchNorm statistics (combined across images on the host).
    stat_ref[0, 0:1, :] = jnp.sum(acc, axis=0, keepdims=True)
    stat_ref[0, 1:2, :] = jnp.sum(acc * acc, axis=0, keepdims=True)

    # Store lane-dense: channels on sublanes, spatial on lanes.
    conv_ref[0] = acc.T


def _bn_tanh_kernel(conv_ref, scale_ref, shift_ref, out_ref):
    # y = tanh(x * scale + shift): folded BatchNorm affine + tanh, all f32.
    out_ref[0] = jnp.tanh(conv_ref[0] * scale_ref[...] + shift_ref[...])


# ------------------------------ host wrapper --------------------------------

@jax.jit
def cnn_cell(x, w, b, gamma, beta):
    """CnnCell forward: Conv2d(k=4,s=2,p=1) + BatchNorm2d(train stats) + tanh.

    x: (N, Cin, H, W) f32 NCHW, H and W even.      w: (Cout, Cin, 4, 4) f32.
    b: (Cout,) conv bias (cancelled by training-mode BN; unused in kernels).
    gamma, beta: (Cout,) BatchNorm affine.         Returns (N, Cout, H//2, W//2).
    """
    del b  # exactly cancelled by the BN mean subtraction (training mode)
    N, Cin, H, W = x.shape
    assert H % 2 == 0 and W % 2 == 0
    Cout = w.shape[0]
    Ho, Wo = H // 2, W // 2
    M = Ho * Wo
    K = 16 * Cin

    # --- host-side layout prep (cheap; no im2col blow-up through HBM) ---
    xp = jnp.pad(x, ((0, 0), (0, 0), (1, 1), (1, 1)))
    xp = jnp.transpose(xp, (0, 2, 3, 1))            # NHWC (N, H+2, W+2, Cin)
    pee = xp[:, 0::2, 0::2, :]                      # (N, Ho+1, Wo+1, Cin)
    peo = xp[:, 0::2, 1::2, :]
    poe = xp[:, 1::2, 0::2, :]
    poo = xp[:, 1::2, 1::2, :]
    # Patch-column order (kh, kw, cin) -> weight (16*Cin, Cout), bf16 for MXU.
    w2 = jnp.transpose(w, (2, 3, 1, 0)).reshape(K, Cout).astype(jnp.bfloat16)

    cparams = pltpu.CompilerParams(
        dimension_semantics=("parallel",),
        vmem_limit_bytes=32 * 1024 * 1024,   # safe on v5e/v6e (128 MiB) and v7x (64 MiB)
    )

    # --- pass 1: fused in-VMEM im2col + conv matmul + partial BN statistics ---
    # TODO(synk): for very large images, row-tile each image with a manual
    # pl.ANY + make_async_copy pipeline; the per-image block must fit VMEM here.
    phase_spec = pl.BlockSpec((1, Ho + 1, Wo + 1, Cin), lambda n: (n, 0, 0, 0))
    conv, stats = pl.pallas_call(
        _conv_stats_kernel,
        grid=(N,),
        in_specs=[phase_spec, phase_spec, phase_spec, phase_spec,
                  pl.BlockSpec((K, Cout), lambda n: (0, 0))],
        out_specs=[pl.BlockSpec((1, Cout, M), lambda n: (n, 0, 0)),
                   pl.BlockSpec((1, 2, Cout), lambda n: (n, 0, 0))],
        out_shape=[jax.ShapeDtypeStruct((N, Cout, M), jnp.float32),
                   jax.ShapeDtypeStruct((N, 2, Cout), jnp.float32)],
        scratch_shapes=[pltpu.VMEM((Ho, Wo, K), jnp.float32)],
        compiler_params=cparams,
    )(pee, peo, poe, poo, w2)

    # --- combine partial stats -> folded per-channel BN scale / shift (tiny) ---
    tot = jnp.sum(stats, axis=0)                    # (2, Cout)
    count = N * M
    mean = tot[0] / count
    var = jnp.maximum(tot[1] / count - mean * mean, 0.0)   # biased variance
    scale = gamma * jax.lax.rsqrt(var + BN_EPS)
    shift = beta - mean * scale

    # --- pass 2: fused BatchNorm + tanh (lane-dense elementwise) ---
    y = pl.pallas_call(
        _bn_tanh_kernel,
        grid=(N,),
        in_specs=[pl.BlockSpec((1, Cout, M), lambda n: (n, 0, 0)),
                  pl.BlockSpec((Cout, 1), lambda n: (0, 0)),
                  pl.BlockSpec((Cout, 1), lambda n: (0, 0))],
        out_specs=pl.BlockSpec((1, Cout, M), lambda n: (n, 0, 0)),
        out_shape=jax.ShapeDtypeStruct((N, Cout, M), jnp.float32),
        compiler_params=cparams,
    )(conv, scale.reshape(Cout, 1), shift.reshape(Cout, 1))

    # NCHW output is a free reshape (spatial axis is already lane-dense).
    return y.reshape(N, Cout, Ho, Wo)


# ------------------------------ pure-JAX reference ---------------------------

def cnn_cell_reference(x, w, b, gamma, beta):
    y = jax.lax.conv_general_dilated(
        x, w, window_strides=(2, 2), padding=((1, 1), (1, 1)),
        dimension_numbers=("NCHW", "OIHW", "NCHW"))
    y = y + b.reshape(1, -1, 1, 1)
    mean = jnp.mean(y, axis=(0, 2, 3), keepdims=True)
    var = jnp.mean(jnp.square(y - mean), axis=(0, 2, 3), keepdims=True)
    yn = (y - mean) * jax.lax.rsqrt(var + BN_EPS)
    return jnp.tanh(yn * gamma.reshape(1, -1, 1, 1) + beta.reshape(1, -1, 1, 1))


if __name__ == "__main__":
    N, Cin, Cout, H, W = 2, 4, 8, 16, 16
    kx, kw, kb, kg, kbe = jax.random.split(jax.random.PRNGKey(0), 5)
    x = jax.random.normal(kx, (N, Cin, H, W), jnp.float32)
    w = 0.2 * jax.random.normal(kw, (Cout, Cin, 4, 4), jnp.float32)
    b = 0.05 * jax.random.normal(kb, (Cout,), jnp.float32)
    gamma = 1.0 + 0.1 * jax.random.normal(kg, (Cout,), jnp.float32)
    beta = 0.05 * jax.random.normal(kbe, (Cout,), jnp.float32)

    out = jax.block_until_ready(cnn_cell(x, w, b, gamma, beta))
    assert out.shape == (N, Cout, H // 2, W // 2), out.shape
    assert bool(jnp.all(jnp.isfinite(out)))

    # Correctness vs. f32 XLA reference (tolerance covers the bf16 MXU operands).
    ref = cnn_cell_reference(x, w, b, gamma, beta)
    max_err = float(jnp.max(jnp.abs(out - ref)))
    assert max_err < 7.5e-2, f"max abs error vs reference: {max_err}"

    print("KERNEL_OK")
</pallas_src>

<mosaic_0001>
module attributes {stable_mosaic.version = 11 : i64} {
  func.func @_conv_stats_kernel(%arg0: i32, %arg1: memref<1x9x9x4xf32, #tpu.memory_space<vmem>>, %arg2: memref<1x9x9x4xf32, #tpu.memory_space<vmem>>, %arg3: memref<1x9x9x4xf32, #tpu.memory_space<vmem>>, %arg4: memref<1x9x9x4xf32, #tpu.memory_space<vmem>>, %arg5: memref<64x8xbf16, #tpu.memory_space<vmem>>, %arg6: memref<1x8x64xf32, #tpu.memory_space<vmem>>, %arg7: memref<1x2x8xf32, #tpu.memory_space<vmem>>, %arg8: memref<8x8x64xf32, #tpu.memory_space<vmem>>) attributes {dimension_semantics = [#tpu.dimension_semantics<parallel>], iteration_bounds = array<i64: 2>, scalar_prefetch = 0 : i64, scratch_operands = 1 : i64, tpu.core_type = #tpu.core_type<tc>, window_params = [{transform_indices = @transform_0, window_bounds = array<i64: 1, 9, 9, 4>}, {transform_indices = @transform_1, window_bounds = array<i64: 1, 9, 9, 4>}, {transform_indices = @transform_2, window_bounds = array<i64: 1, 9, 9, 4>}, {transform_indices = @transform_3, window_bounds = array<i64: 1, 9, 9, 4>}, {pipeline_mode = #tpu.pipeline_mode<synchronous>, transform_indices = @transform_4, window_bounds = array<i64: 64, 8>}, {transform_indices = @transform_5, window_bounds = array<i64: 1, 8, 64>}, {transform_indices = @transform_6, window_bounds = array<i64: 1, 2, 8>}]} {
    %c0 = arith.constant 0 : index
    %c0_0 = arith.constant 0 : index
    %c0_1 = arith.constant 0 : index
    %c0_2 = arith.constant 0 : index
    %0 = vector.load %arg1[%c0, %c0_0, %c0_1, %c0_2] : memref<1x9x9x4xf32, #tpu.memory_space<vmem>>, vector<1x8x8x4xf32>
    %1 = vector.shape_cast %0 : vector<1x8x8x4xf32> to vector<8x8x4xf32>
    %c0_3 = arith.constant 0 : index
    %c0_4 = arith.constant 0 : index
    %c0_5 = arith.constant 0 : index
    %2 = vector.load %arg8[%c0_3, %c0_4, %c0_5] : memref<8x8x64xf32, #tpu.memory_space<vmem>>, vector<8x8x4xf32>
    tpu.vector_store %arg8[%c0_3, %c0_4, %c0_5], %1 {strides = array<i32>} : memref<8x8x64xf32, #tpu.memory_space<vmem>>, vector<8x8x4xf32>,
    %c0_6 = arith.constant 0 : index
    %c0_7 = arith.constant 0 : index
    %c0_8 = arith.constant 0 : index
    %c0_9 = arith.constant 0 : index
    %3 = vector.load %arg2[%c0_6, %c0_7, %c0_8, %c0_9] : memref<1x9x9x4xf32, #tpu.memory_space<vmem>>, vector<1x8x8x4xf32>
    %4 = vector.shape_cast %3 : vector<1x8x8x4xf32> to vector<8x8x4xf32>
    %c0_10 = arith.constant 0 : index
    %c0_11 = arith.constant 0 : index
    %c4 = arith.constant 4 : index
    %5 = vector.load %arg8[%c0_10, %c0_11, %c4] : memref<8x8x64xf32, #tpu.memory_space<vmem>>, vector<8x8x4xf32>
    tpu.vector_store %arg8[%c0_10, %c0_11, %c4], %4 {strides = array<i32>} : memref<8x8x64xf32, #tpu.memory_space<vmem>>, vector<8x8x4xf32>,
    %c0_12 = arith.constant 0 : index
    %c0_13 = arith.constant 0 : index
    %c1 = arith.constant 1 : index
    %c0_14 = arith.constant 0 : index
    %6 = vector.load %arg1[%c0_12, %c0_13, %c1, %c0_14] : memref<1x9x9x4xf32, #tpu.memory_space<vmem>>, vector<1x8x8x4xf32>
    %7 = vector.shape_cast %6 : vector<1x8x8x4xf32> to vector<8x8x4xf32>
    %c0_15 = arith.constant 0 : index
    %c0_16 = arith.constant 0 : index
    %c8 = arith.constant 8 : index
    %8 = vector.load %arg8[%c0_15, %c0_16, %c8] : memref<8x8x64xf32, #tpu.memory_space<vmem>>, vector<8x8x4xf32>
    tpu.vector_store %arg8[%c0_15, %c0_16, %c8], %7 {strides = array<i32>} : memref<8x8x64xf32, #tpu.memory_space<vmem>>, vector<8x8x4xf32>,
    %c0_17 = arith.constant 0 : index
    %c0_18 = arith.constant 0 : index
    %c1_19 = arith.constant 1 : index
    %c0_20 = arith.constant 0 : index
    %9 = vector.load %arg2[%c0_17, %c0_18, %c1_19, %c0_20] : memref<1x9x9x4xf32, #tpu.memory_space<vmem>>, vector<1x8x8x4xf32>
    %10 = vector.shape_cast %9 : vector<1x8x8x4xf32> to vector<8x8x4xf32>
    %c0_21 = arith.constant 0 : index
    %c0_22 = arith.constant 0 : index
    %c12 = arith.constant 12 : index
    %11 = vector.load %arg8[%c0_21, %c0_22, %c12] : memref<8x8x64xf32, #tpu.memory_space<vmem>>, vector<8x8x4xf32>
    tpu.vector_store %arg8[%c0_21, %c0_22, %c12], %10 {strides = array<i32>} : memref<8x8x64xf32, #tpu.memory_space<vmem>>, vector<8x8x4xf32>,
    %c0_23 = arith.constant 0 : index
    %c0_24 = arith.constant 0 : index
    %c0_25 = arith.constant 0 : index
    %c0_26 = arith.constant 0 : index
    %12 = vector.load %arg3[%c0_23, %c0_24, %c0_25, %c0_26] : memref<1x9x9x4xf32, #tpu.memory_space<vmem>>, vector<1x8x8x4xf32>
    %13 = vector.shape_cast %12 : vector<1x8x8x4xf32> to vector<8x8x4xf32>
    %c0_27 = arith.constant 0 : index
    %c0_28 = arith.constant 0 : index
    %c16 = arith.constant 16 : index
    %14 = vector.load %arg8[%c0_27, %c0_28, %c16] : memref<8x8x64xf32, #tpu.memory_space<vmem>>, vector<8x8x4xf32>
    tpu.vector_store %arg8[%c0_27, %c0_28, %c16], %13 {strides = array<i32>} : memref<8x8x64xf32, #tpu.memory_space<vmem>>, vector<8x8x4xf32>,
    %c0_29 = arith.constant 0 : index
    %c0_30 = arith.constant 0 : index
    %c0_31 = arith.constant 0 : index
    %c0_32 = arith.constant 0 : index
    %15 = vector.load %arg4[%c0_29, %c0_30, %c0_31, %c0_32] : memref<1x9x9x4xf32, #tpu.memory_space<vmem>>, vector<1x8x8x4xf32>
    %16 = vector.shape_cast %15 : vector<1x8x8x4xf32> to vector<8x8x4xf32>
    %c0_33 = arith.constant 0 : index
    %c0_34 = arith.constant 0 : index
    %c20 = arith.constant 20 : index
    %17 = vector.load %arg8[%c0_33, %c0_34, %c20] : memref<8x8x64xf32, #tpu.memory_space<vmem>>, vector<8x8x4xf32>
    tpu.vector_store %arg8[%c0_33, %c0_34, %c20], %16 {strides = array<i32>} : memref<8x8x64xf32, #tpu.memory_space<vmem>>, vector<8x8x4xf32>,
    %c0_35 = arith.constant 0 : index
    %c0_36 = arith.constant 0 : index
    %c1_37 = arith.constant 1 : index
    %c0_38 = arith.constant 0 : index
    %18 = vector.load %arg3[%c0_35, %c0_36, %c1_37, %c0_38] : memref<1x9x9x4xf32, #tpu.memory_space<vmem>>, vector<1x8x8x4xf32>
    %19 = vector.shape_cast %18 : vector<1x8x8x4xf32> to vector<8x8x4xf32>
    %c0_39 = arith.constant 0 : index
    %c0_40 = arith.constant 0 : index
    %c24 = arith.constant 24 : index
    %20 = vector.load %arg8[%c0_39, %c0_40, %c24] : memref<8x8x64xf32, #tpu.memory_space<vmem>>, vector<8x8x4xf32>
    tpu.vector_store %arg8[%c0_39, %c0_40, %c24], %19 {strides = array<i32>} : memref<8x8x64xf32, #tpu.memory_space<vmem>>, vector<8x8x4xf32>,
    %c0_41 = arith.constant 0 : index
    %c0_42 = arith.constant 0 : index
    %c1_43 = arith.constant 1 : index
    %c0_44 = arith.constant 0 : index
    %21 = vector.load %arg4[%c0_41, %c0_42, %c1_43, %c0_44] : memref<1x9x9x4xf32, #tpu.memory_space<vmem>>, vector<1x8x8x4xf32>
    %22 = vector.shape_cast %21 : vector<1x8x8x4xf32> to vector<8x8x4xf32>
    %c0_45 = arith.constant 0 : index
    %c0_46 = arith.constant 0 : index
    %c28 = arith.constant 28 : index
    %23 = vector.load %arg8[%c0_45, %c0_46, %c28] : memref<8x8x64xf32, #tpu.memory_space<vmem>>, vector<8x8x4xf32>
    tpu.vector_store %arg8[%c0_45, %c0_46, %c28], %22 {strides = array<i32>} : memref<8x8x64xf32, #tpu.memory_space<vmem>>, vector<8x8x4xf32>,
    %c0_47 = arith.constant 0 : index
    %c1_48 = arith.constant 1 : index
    %c0_49 = arith.constant 0 : index
    %c0_50 = arith.constant 0 : index
    %24 = vector.load %arg1[%c0_47, %c1_48, %c0_49, %c0_50] : memref<1x9x9x4xf32, #tpu.memory_space<vmem>>, vector<1x8x8x4xf32>
    %25 = vector.shape_cast %24 : vector<1x8x8x4xf32> to vector<8x8x4xf32>
    %c0_51 = arith.constant 0 : index
    %c0_52 = arith.constant 0 : index
    %c32 = arith.constant 32 : index
    %26 = vector.load %arg8[%c0_51, %c0_52, %c32] : memref<8x8x64xf32, #tpu.memory_space<vmem>>, vector<8x8x4xf32>
    tpu.vector_store %arg8[%c0_51, %c0_52, %c32], %25 {strides = array<i32>} : memref<8x8x64xf32, #tpu.memory_space<vmem>>, vector<8x8x4xf32>,
    %c0_53 = arith.constant 0 : index
    %c1_54 = arith.constant 1 : index
    %c0_55 = arith.constant 0 : index
    %c0_56 = arith.constant 0 : index
    %27 = vector.load %arg2[%c0_53, %c1_54, %c0_55, %c0_56] : memref<1x9x9x4xf32, #tpu.memory_space<vmem>>, vector<1x8x8x4xf32>
    %28 = vector.shape_cast %27 : vector<1x8x8x4xf32> to vector<8x8x4xf32>
    %c0_57 = arith.constant 0 : index
    %c0_58 = arith.constant 0 : index
    %c36 = arith.constant 36 : index
    %29 = vector.load %arg8[%c0_57, %c0_58, %c36] : memref<8x8x64xf32, #tpu.memory_space<vmem>>, vector<8x8x4xf32>
    tpu.vector_store %arg8[%c0_57, %c0_58, %c36], %28 {strides = array<i32>} : memref<8x8x64xf32, #tpu.memory_space<vmem>>, vector<8x8x4xf32>,
    %c0_59 = arith.constant 0 : index
    %c1_60 = arith.constant 1 : index
    %c1_61 = arith.constant 1 : index
    %c0_62 = arith.constant 0 : index
    %30 = vector.load %arg1[%c0_59, %c1_60, %c1_61, %c0_62] : memref<1x9x9x4xf32, #tpu.memory_space<vmem>>, vector<1x8x8x4xf32>
    %31 = vector.shape_cast %30 : vector<1x8x8x4xf32> to vector<8x8x4xf32>
    %c0_63 = arith.constant 0 : index
    %c0_64 = arith.constant 0 : index
    %c40 = arith.constant 40 : index
    %32 = vector.load %arg8[%c0_63, %c0_64, %c40] : memref<8x8x64xf32, #tpu.memory_space<vmem>>, vector<8x8x4xf32>
    tpu.vector_store %arg8[%c0_63, %c0_64, %c40], %31 {strides = array<i32>} : memref<8x8x64xf32, #tpu.memory_space<vmem>>, vector<8x8x4xf32>,
    %c0_65 = arith.constant 0 : index
    %c1_66 = arith.constant 1 : index
    %c1_67 = arith.constant 1 : index
    %c0_68 = arith.constant 0 : index
    %33 = vector.load %arg2[%c0_65, %c1_66, %c1_67, %c0_68] : memref<1x9x9x4xf32, #tpu.memory_space<vmem>>, vector<1x8x8x4xf32>
    %34 = vector.shape_cast %33 : vector<1x8x8x4xf32> to vector<8x8x4xf32>
    %c0_69 = arith.constant 0 : index
    %c0_70 = arith.constant 0 : index
    %c44 = arith.constant 44 : index
    %35 = vector.load %arg8[%c0_69, %c0_70, %c44] : memref<8x8x64xf32, #tpu.memory_space<vmem>>, vector<8x8x4xf32>
    tpu.vector_store %arg8[%c0_69, %c0_70, %c44], %34 {strides = array<i32>} : memref<8x8x64xf32, #tpu.memory_space<vmem>>, vector<8x8x4xf32>,
    %c0_71 = arith.constant 0 : index
    %c1_72 = arith.constant 1 : index
    %c0_73 = arith.constant 0 : index
    %c0_74 = arith.constant 0 : index
    %36 = vector.load %arg3[%c0_71, %c1_72, %c0_73, %c0_74] : memref<1x9x9x4xf32, #tpu.memory_space<vmem>>, vector<1x8x8x4xf32>
    %37 = vector.shape_cast %36 : vector<1x8x8x4xf32> to vector<8x8x4xf32>
    %c0_75 = arith.constant 0 : index
    %c0_76 = arith.constant 0 : index
    %c48 = arith.constant 48 : index
    %38 = vector.load %arg8[%c0_75, %c0_76, %c48] : memref<8x8x64xf32, #tpu.memory_space<vmem>>, vector<8x8x4xf32>
    tpu.vector_store %arg8[%c0_75, %c0_76, %c48], %37 {strides = array<i32>} : memref<8x8x64xf32, #tpu.memory_space<vmem>>, vector<8x8x4xf32>,
    %c0_77 = arith.constant 0 : index
    %c1_78 = arith.constant 1 : index
    %c0_79 = arith.constant 0 : index
    %c0_80 = arith.constant 0 : index
    %39 = vector.load %arg4[%c0_77, %c1_78, %c0_79, %c0_80] : memref<1x9x9x4xf32, #tpu.memory_space<vmem>>, vector<1x8x8x4xf32>
    %40 = vector.shape_cast %39 : vector<1x8x8x4xf32> to vector<8x8x4xf32>
    %c0_81 = arith.constant 0 : index
    %c0_82 = arith.constant 0 : index
    %c52 = arith.constant 52 : index
    %41 = vector.load %arg8[%c0_81, %c0_82, %c52] : memref<8x8x64xf32, #tpu.memory_space<vmem>>, vector<8x8x4xf32>
    tpu.vector_store %arg8[%c0_81, %c0_82, %c52], %40 {strides = array<i32>} : memref<8x8x64xf32, #tpu.memory_space<vmem>>, vector<8x8x4xf32>,
    %c0_83 = arith.constant 0 : index
    %c1_84 = arith.constant 1 : index
    %c1_85 = arith.constant 1 : index
    %c0_86 = arith.constant 0 : index
    %42 = vector.load %arg3[%c0_83, %c1_84, %c1_85, %c0_86] : memref<1x9x9x4xf32, #tpu.memory_space<vmem>>, vector<1x8x8x4xf32>
    %43 = vector.shape_cast %42 : vector<1x8x8x4xf32> to vector<8x8x4xf32>
    %c0_87 = arith.constant 0 : index
    %c0_88 = arith.constant 0 : index
    %c56 = arith.constant 56 : index
    %44 = vector.load %arg8[%c0_87, %c0_88, %c56] : memref<8x8x64xf32, #tpu.memory_space<vmem>>, vector<8x8x4xf32>
    tpu.vector_store %arg8[%c0_87, %c0_88, %c56], %43 {strides = array<i32>} : memref<8x8x64xf32, #tpu.memory_space<vmem>>, vector<8x8x4xf32>,
    %c0_89 = arith.constant 0 : index
    %c1_90 = arith.constant 1 : index
    %c1_91 = arith.constant 1 : index
    %c0_92 = arith.constant 0 : index
    %45 = vector.load %arg4[%c0_89, %c1_90, %c1_91, %c0_92] : memref<1x9x9x4xf32, #tpu.memory_space<vmem>>, vector<1x8x8x4xf32>
    %46 = vector.shape_cast %45 : vector<1x8x8x4xf32> to vector<8x8x4xf32>
    %c0_93 = arith.constant 0 : index
    %c0_94 = arith.constant 0 : index
    %c60 = arith.constant 60 : index
    %47 = vector.load %arg8[%c0_93, %c0_94, %c60] : memref<8x8x64xf32, #tpu.memory_space<vmem>>, vector<8x8x4xf32>
    tpu.vector_store %arg8[%c0_93, %c0_94, %c60], %46 {strides = array<i32>} : memref<8x8x64xf32, #tpu.memory_space<vmem>>, vector<8x8x4xf32>,
    %c0_95 = arith.constant 0 : index
    %c0_96 = arith.constant 0 : index
    %c0_97 = arith.constant 0 : index
    %48 = vector.load %arg8[%c0_95, %c0_96, %c0_97] : memref<8x8x64xf32, #tpu.memory_space<vmem>>, vector<8x8x64xf32>
    %49 = vector.shape_cast %48 : vector<8x8x64xf32> to vector<64x64xf32>
    %50 = arith.truncf %49 : vector<64x64xf32> to vector<64x64xbf16>
    %c0_98 = arith.constant 0 : index
    %c0_99 = arith.constant 0 : index
    %51 = vector.load %arg5[%c0_98, %c0_99] : memref<64x8xbf16, #tpu.memory_space<vmem>>, vector<64x8xbf16>
    %cst = arith.constant dense<0.000000e+00> : vector<64x8xf32>
    %52 = tpu.matmul %50, %51, %cst {dimension_numbers = #tpu.dot_dimension_numbers<[1], [0], [0], [1], [0, 0, 1, 1], [], []>} : vector<64x64xbf16>, vector<64x8xbf16>, vector<64x8xf32> -> vector<64x8xf32>
    %cst_100 = arith.constant dense<0.000000e+00> : vector<8xf32>
    %53 = vector.multi_reduction <add>, %52, %cst_100 [0] : vector<64x8xf32> to vector<8xf32>
    %54 = vector.shape_cast %53 : vector<8xf32> to vector<1x8xf32>
    %c0_101 = arith.constant 0 : index
    %c0_102 = arith.constant 0 : index
    %c0_103 = arith.constant 0 : index
    %55 = vector.load %arg7[%c0_101, %c0_102, %c0_103] : memref<1x2x8xf32, #tpu.memory_space<vmem>>, vector<1x1x8xf32>
    %56 = vector.shape_cast %55 : vector<1x1x8xf32> to vector<1x8xf32>
    %57 = vector.shape_cast %54 : vector<1x8xf32> to vector<1x1x8xf32>
    tpu.vector_store %arg7[%c0_101, %c0_102, %c0_103], %57 {strides = array<i32>} : memref<1x2x8xf32, #tpu.memory_space<vmem>>, vector<1x1x8xf32>,
    %58 = arith.mulf %52, %52 : vector<64x8xf32>
    %cst_104 = arith.constant dense<0.000000e+00> : vector<8xf32>
    %59 = vector.multi_reduction <add>, %58, %cst_104 [0] : vector<64x8xf32> to vector<8xf32>
    %60 = vector.shape_cast %59 : vector<8xf32> to vector<1x8xf32>
    %c0_105 = arith.constant 0 : index
    %c1_106 = arith.constant 1 : index
    %c0_107 = arith.constant 0 : index
    %61 = vector.load %arg7[%c0_105, %c1_106, %c0_107] : memref<1x2x8xf32, #tpu.memory_space<vmem>>, vector<1x1x8xf32>
    %62 = vector.shape_cast %61 : vector<1x1x8xf32> to vector<1x8xf32>
    %63 = vector.shape_cast %60 : vector<1x8xf32> to vector<1x1x8xf32>
    tpu.vector_store %arg7[%c0_105, %c1_106, %c0_107], %63 {strides = array<i32>} : memref<1x2x8xf32, #tpu.memory_space<vmem>>, vector<1x1x8xf32>,
    %64 = tpu.transpose %52, [1, 0] : vector<64x8xf32> -> vector<8x64xf32>
    %c0_108 = arith.constant 0 : index
    %c0_109 = arith.constant 0 : index
    %c0_110 = arith.constant 0 : index
    %65 = vector.load %arg6[%c0_108, %c0_109, %c0_110] : memref<1x8x64xf32, #tpu.memory_space<vmem>>, vector<1x8x64xf32>
    %66 = vector.shape_cast %65 : vector<1x8x64xf32> to vector<8x64xf32>
    %67 = vector.shape_cast %64 : vector<8x64xf32> to vector<1x8x64xf32>
    tpu.vector_store %arg6[%c0_108, %c0_109, %c0_110], %67 {strides = array<i32>} : memref<1x8x64xf32, #tpu.memory_space<vmem>>, vector<1x8x64xf32>,
    return
  }
  func.func @transform_0(%arg0: i32) -> (i32, i32, i32, i32) {
    %c0_i32 = arith.constant 0 : i32
    %c0_i32_0 = arith.constant 0 : i32
    %c0_i32_1 = arith.constant 0 : i32
    %c0_i32_2 = arith.constant 0 : i32
    return %arg0, %c0_i32, %c0_i32_0, %c0_i32_1 : i32, i32, i32, i32
  }
  func.func @transform_1(%arg0: i32) -> (i32, i32, i32, i32) {
    %c0_i32 = arith.constant 0 : i32
    %c0_i32_0 = arith.constant 0 : i32
    %c0_i32_1 = arith.constant 0 : i32
    %c0_i32_2 = arith.constant 0 : i32
    return %arg0, %c0_i32, %c0_i32_0, %c0_i32_1 : i32, i32, i32, i32
  }
  func.func @transform_2(%arg0: i32) -> (i32, i32, i32, i32) {
    %c0_i32 = arith.constant 0 : i32
    %c0_i32_0 = arith.constant 0 : i32
    %c0_i32_1 = arith.constant 0 : i32
    %c0_i32_2 = arith.constant 0 : i32
    return %arg0, %c0_i32, %c0_i32_0, %c0_i32_1 : i32, i32, i32, i32
  }
  func.func @transform_3(%arg0: i32) -> (i32, i32, i32, i32) {
    %c0_i32 = arith.constant 0 : i32
    %c0_i32_0 = arith.constant 0 : i32
    %c0_i32_1 = arith.constant 0 : i32
    %c0_i32_2 = arith.constant 0 : i32
    return %arg0, %c0_i32, %c0_i32_0, %c0_i32_1 : i32, i32, i32, i32
  }
  func.func @transform_4(%arg0: i32) -> (i32, i32) {
    %c0_i32 = arith.constant 0 : i32
    %c0_i32_0 = arith.constant 0 : i32
    %c0_i32_1 = arith.constant 0 : i32
    return %c0_i32, %c0_i32_0 : i32, i32
  }
  func.func @transform_5(%arg0: i32) -> (i32, i32, i32) {
    %c0_i32 = arith.constant 0 : i32
    %c0_i32_0 = arith.constant 0 : i32
    %c0_i32_1 = arith.constant 0 : i32
    return %arg0, %c0_i32, %c0_i32_0 : i32, i32, i32
  }
  func.func @transform_6(%arg0: i32) -> (i32, i32, i32) {
    %c0_i32 = arith.constant 0 : i32
    %c0_i32_0 = arith.constant 0 : i32
    %c0_i32_1 = arith.constant 0 : i32
    return %arg0, %c0_i32, %c0_i32_0 : i32, i32, i32
  }
}

module attributes {stable_mosaic.version = 11 : i64} {
  func.func @_bn_tanh_kernel(%arg0: i32, %arg1: memref<1x8x64xf32, #tpu.memory_space<vmem>>, %arg2: memref<8x1xf32, #tpu.memory_space<vmem>>, %arg3: memref<8x1xf32, #tpu.memory_space<vmem>>, %arg4: memref<1x8x64xf32, #tpu.memory_space<vmem>>) attributes {dimension_semantics = [#tpu.dimension_semantics<parallel>], iteration_bounds = array<i64: 2>, scalar_prefetch = 0 : i64, scratch_operands = 0 : i64, tpu.core_type = #tpu.core_type<tc>, window_params = [{transform_indices = @transform_0, window_bounds = array<i64: 1, 8, 64>}, {pipeline_mode = #tpu.pipeline_mode<synchronous>, transform_indices = @transform_1, window_bounds = array<i64: 8, 1>}, {pipeline_mode = #tpu.pipeline_mode<synchronous>, transform_indices = @transform_2, window_bounds = array<i64: 8, 1>}, {transform_indices = @transform_3, window_bounds = array<i64: 1, 8, 64>}]} {
    %c0 = arith.constant 0 : index
    %c0_0 = arith.constant 0 : index
    %c0_1 = arith.constant 0 : index
    %0 = vector.load %arg1[%c0, %c0_0, %c0_1] : memref<1x8x64xf32, #tpu.memory_space<vmem>>, vector<1x8x64xf32>
    %1 = vector.shape_cast %0 : vector<1x8x64xf32> to vector<8x64xf32>
    %c0_2 = arith.constant 0 : index
    %c0_3 = arith.constant 0 : index
    %2 = vector.load %arg2[%c0_2, %c0_3] : memref<8x1xf32, #tpu.memory_space<vmem>>, vector<8x1xf32>
    %3 = vector.broadcast %2 : vector<8x1xf32> to vector<8x64xf32>
    %4 = arith.mulf %1, %3 : vector<8x64xf32>
    %c0_4 = arith.constant 0 : index
    %c0_5 = arith.constant 0 : index
    %5 = vector.load %arg3[%c0_4, %c0_5] : memref<8x1xf32, #tpu.memory_space<vmem>>, vector<8x1xf32>
    %6 = vector.broadcast %5 : vector<8x1xf32> to vector<8x64xf32>
    %7 = arith.addf %4, %6 : vector<8x64xf32>
    %8 = math.tanh %7 : vector<8x64xf32>
    %c0_6 = arith.constant 0 : index
    %c0_7 = arith.constant 0 : index
    %c0_8 = arith.constant 0 : index
    %9 = vector.load %arg4[%c0_6, %c0_7, %c0_8] : memref<1x8x64xf32, #tpu.memory_space<vmem>>, vector<1x8x64xf32>
    %10 = vector.shape_cast %9 : vector<1x8x64xf32> to vector<8x64xf32>
    %11 = vector.shape_cast %8 : vector<8x64xf32> to vector<1x8x64xf32>
    tpu.vector_store %arg4[%c0_6, %c0_7, %c0_8], %11 {strides = array<i32>} : memref<1x8x64xf32, #tpu.memory_space<vmem>>, vector<1x8x64xf32>,
    return
  }
  func.func @transform_0(%arg0: i32) -> (i32, i32, i32) {
    %c0_i32 = arith.constant 0 : i32
    %c0_i32_0 = arith.constant 0 : i32
    %c0_i32_1 = arith.constant 0 : i32
    return %arg0, %c0_i32, %c0_i32_0 : i32, i32, i32
  }
  func.func @transform_1(%arg0: i32) -> (i32, i32) {
    %c0_i32 = arith.constant 0 : i32
    %c0_i32_0 = arith.constant 0 : i32
    %c0_i32_1 = arith.constant 0 : i32
    return %c0_i32, %c0_i32_0 : i32, i32
  }
  func.func @transform_2(%arg0: i32) -> (i32, i32) {
    %c0_i32 = arith.constant 0 : i32
    %c0_i32_0 = arith.constant 0 : i32
    %c0_i32_1 = arith.constant 0 : i32
    return %c0_i32, %c0_i32_0 : i32, i32
  }
  func.func @transform_3(%arg0: i32) -> (i32, i32, i32) {
    %c0_i32 = arith.constant 0 : i32
    %c0_i32_0 = arith.constant 0 : i32
    %c0_i32_1 = arith.constant 0 : i32
    return %arg0, %c0_i32, %c0_i32_0 : i32, i32, i32
  }
}

</mosaic_0001>

<bundles_post_ra>
// kernel: cnn_cell.3
= control target key start
LH: loop header
LB: loop body
LE: loop exit
PB: predicated region body
PF: predicated region fallthrough
CT: control target
= control target key end

     0   :  { %s287_s12 = smov 0   ;;  %s310_s0 = inlined_call_operand.vmem [shape: f32[2,8,64], index: 0, kind: input, shape index: {}]   ;;  %s311_s1 = inlined_call_operand.vmem [shape: f32[8,1], index: 1, kind: input, shape index: {}]   ;;  %s312_s2 = inlined_call_operand.vmem [shape: f32[8,1], index: 2, kind: input, shape index: {}]   ;;  %s313_s3 = inlined_call_operand.vmem [shape: f32[2,8,64], index: 3, kind: output, shape index: {}]  }
   0x1 LB: > { %s237_s13 = sadd.s32 4294967295, %s264_s12   ;;  %p241_p0 = scmp.ge.s32.totalorder %s264_s12, 1  ;;  %s264_s12 = sphi %s287_s12, %s13_s12  }
   0x2   : > { %p136_p1 = scmp.lt.s32.totalorder %s264_s12, 3 }
   0x4   : > { %p137_p2 = pnand %p241_p0, %p136_p1 }
   0x5   : > { %v167_v0 = vld [vmem:[%s311_s1] sm:$0xff] (!%p137_p2)  ;;  %v266_v1 = vmov (!%p137_p2), 0   ;;  %p158_p3 = scmp.lt.s32.totalorder (!%p137_p2), %s237_s13, 1  ;;  %vm182_vm0 = vcmask (!%p137_p2), 523264  }
   0x6   : > { %140 = sbr.rel (%p137_p2) target bundleno = 153 (0x99), region = 32  ;;  %255 = vset.pattern.permute.xlu0 (!%p137_p2), %v266_v1  ;;  %v174_v2 = vld [vmem:[%s312_s2] sm:$0xff] (!%p137_p2) }
   0x7   : > { %170 = vperm.xlu0 (!%p137_p2), %255, %v167_v0  }
   0xb   : > { %177 = vperm.xlu0 (!%p137_p2), %255, %v174_v2  }
   0xd   : > { %s315_s13 = smov (!%p158_p3, %s237_s13), 1 }
   0xe   : > { %s242_s18 = sshll.u32 %s315_s13, 3 }
   0xf   : > { %s161_s21 = scalar_lea.vmem %s310_s0, %s242_s18  ;;  %s165_s24 = scalar_lea.vmem %s313_s3, %s242_s18 }
  0x10   : > { %v166_v4 = vld [vmem:[%s161_s21] sm:$0xff] }
  0x86   : > { %v171_v3 = vpop.permute.xlu0 %170 }
  0x87   : > { %v173_v5 = vmul.f32 %v171_v3, %v166_v4 }
  0x8a   : > { %v178_v6 = vpop.permute.xlu0 %177 }
  0x8b   : > { %v180_v7 = vadd.f32 %v178_v6, %v173_v5 }
  0x8d   : > { %256 = vtanh.f32 %v180_v7 }
  0x97   : > { %v257_v8 = vpop.eup %256 }
  0x98   : > { %183 = vst.msk [vmem:[%s165_s24] sm:$0xff] %vm182_vm0, %v257_v8 }
  0x99 PF: > { %s13_s12 = sadd.s32 1, %s264_s12  }
  0x9a   : > { %p10_p4 = scmp.ge.s32.totalorder %s13_s12, 4  }
  0x9c   :  { %12 = sbr.rel (!%p10_p4) target bundleno = 1 (0x1), region = 62 }

// kernel: cnn_cell.2
= control target key start
LH: loop header
LB: loop body
LE: loop exit
PB: predicated region body
PF: predicated region fallthrough
CT: control target
= control target key end

     0   :  { %s1611_s21 = smov 0   ;;  %s2208_s0 = inlined_call_operand.vmem [shape: f32[2,9,9,4], index: 0, kind: input, shape index: {}]   ;;  %s2209_s1 = inlined_call_operand.vmem [shape: f32[2,9,9,4], index: 1, kind: input, shape index: {}]   ;;  %s2210_s2 = inlined_call_operand.vmem [shape: f32[2,9,9,4], index: 2, kind: input, shape index: {}]   ;;  %s2211_s3 = inlined_call_operand.vmem [shape: f32[2,9,9,4], index: 3, kind: input, shape index: {}]   ;;  %s2212_s4 = inlined_call_operand.vmem [shape: bf16[64,8], index: 4, kind: input, shape index: {}]   ;;  %s2213_s5 = inlined_call_operand.vmem [shape: f32[2,8,64], index: 5, kind: output, shape index: {0}]   ;;  %s2214_s6 = inlined_call_operand.vmem [shape: f32[2,2,8], index: 6, kind: output, shape index: {1}]  }
   0x1 LB: > { %s1407_s22 = sadd.s32 4294967295, %s1559_s21   ;;  %p1411_p0 = scmp.ge.s32.totalorder %s1559_s21, 1  ;;  %s1559_s21 = sphi %s1611_s21, %s17_s21  }
   0x2   : > { %p245_p1 = scmp.lt.s32.totalorder %s1559_s21, 3 }
   0x4   : > { %p246_p2 = pnand %p1411_p0, %p245_p1 }
   0x5   : > { %p293_p3 = scmp.lt.s32.totalorder (!%p246_p2), %s1407_s22, 1  ;;  %s1561_s27 = smov (!%p246_p2), 4   ;;  %vm330_vm0 = vcmask (!%p246_p2), 31744   ;;  %vm379_vm1 = vcmask (!%p246_p2), 64544   ;;  %vm428_vm2 = vcmask (!%p246_p2), 97344   ;;  %vm477_vm3 = vcmask (!%p246_p2), 130144  }
   0x6   : > { %249 = sbr.rel (%p246_p2) target bundleno = 707 (0x2c3), region = 40  ;;  %s1562_s7 = smov (!%p246_p2), 8   ;;  %vm526_vm4 = vcmask (!%p246_p2), 162944   ;;  %vm575_vm5 = vcmask (!%p246_p2), 195744   ;;  %vm624_vm6 = vcmask (!%p246_p2), 228544   ;;  %vm673_vm7 = vcmask (!%p246_p2), 261344  }
   0x7   : > { %s1563_s8 = smov (!%p246_p2), 12   ;;  %s1564_s12 = smov (!%p246_p2), 16   ;;  %vm723_vm8 = vcmask (!%p246_p2), 294144   ;;  %vm773_vm9 = vcmask (!%p246_p2), 326944   ;;  %vm822_vm10 = vcmask (!%p246_p2), 359744   ;;  %vm871_vm11 = vcmask (!%p246_p2), 392544  }
   0x8   : > { %s1565_s16 = smov (!%p246_p2), 20   ;;  %s1566_s17 = smov (!%p246_p2), 24   ;;  %vm921_vm12 = vcmask (!%p246_p2), 425344   ;;  %vm971_vm13 = vcmask (!%p246_p2), 458144   ;;  %vm1020_vm14 = vcmask (!%p246_p2), 490944   ;;  %vm1069_vm15 = vcmask (!%p246_p2), 523744  }
   0x9   : > { %s1567_s18 = smov (!%p246_p2), 28   ;;  %s1568_s19 = smov (!%p246_p2), 32  }
   0xa   : > { %s1569_s20 = smov (!%p246_p2), 36   ;;  %s1571_s24 = smov (!%p246_p2), 44  }
   0xb   : > { %s1572_s25 = smov (!%p246_p2), 48   ;;  %s1574_s28 = smov (!%p246_p2), 56  }
   0xc   : > { %s1575_s13 = smov (!%p246_p2), 60  }
   0xd   : > { %s2216_s22 = smov (!%p293_p3, %s1407_s22), 1 }
   0xe   : > { %s1622_s23 = smul.u32 144, %s2216_s22 }
  0x10   : > { %s1628_s26 = scalar_lea.vmem %s2209_s1, %s1622_s23  ;;  %s1647_s30 = scalar_lea.vmem %s2208_s0, %s1622_s23 }
  0x11   : > { %v1631_v0 = vld [vmem:[%s1628_s26 + $0x20] sm:$0xff]  ;;  %v1638_v2 = vld [vmem:[%s1628_s26 + $0x30] sm:$0xff]  ;;  %s1709_s11 = scalar_lea.vmem %s2210_s2, %s1622_s23  ;;  %s1732_s15 = scalar_lea.vmem %s2211_s3, %s1622_s23 }
  0x12   : > { %v339_v1 = vld [vmem:[%s1628_s26] sm:$0xff]  ;;  %359 = vrot.lane.b32.xlu1 %v1631_v0, %s1561_s27  ;;  %v1641_v3 = vld [vmem:[%s1628_s26 + $0x10] sm:$0xff]  ;;  %s1570_s23 = smov 40  }
  0x13   : > { %355 = vrot.lane.b32.xlu0 %v339_v1, %s1561_s27  ;;  %v1654_v4 = vld [vmem:[%s1647_s30 + $0x11] sm:$0xff]  ;;  %v388_v5 = vld [vmem:[%s1647_s30 + $0x1] sm:$0xff] }
  0x14   : > { %v1661_v6 = vld [vmem:[%s1647_s30 + $0x31] sm:$0xff]  ;;  %v1664_v7 = vld [vmem:[%s1647_s30 + $0x21] sm:$0xff] }
  0x15   : > { %v1667_v8 = vld [vmem:[%s1647_s30 + $0x20] sm:$0xff]  ;;  %v1670_v9 = vld [vmem:[%s1647_s30 + $0x10] sm:$0xff] }
  0x16   : > { %361 = vrot.lane.b32.xlu1 %v1638_v2, %s1561_s27  ;;  %v1673_v10 = vld [vmem:[%s1647_s30 + $0x40] sm:$0xff]  ;;  %333 = vst.msk [vmem:[#allocation2 + $0x10] sm:$0xff] %vm330_vm0, %v1667_v8  ;;  %332 = vst.msk [vmem:[#allocation2 + $0x8] sm:$0xff] %vm330_vm0, %v1670_v9  ;;  %v1680_v11 = vld [vmem:[%s1647_s30 + $0x30] sm:$0xff] }
  0x17   : > { %357 = vrot.lane.b32.xlu0 %v1641_v3, %s1561_s27  ;;  %335 = vst.msk [vmem:[#allocation2 + $0x20] sm:$0xff] %vm330_vm0, %v1673_v10  ;;  %334 = vst.msk [vmem:[#allocation2 + $0x18] sm:$0xff] %vm330_vm0, %v1680_v11  ;;  %v1691_v12 = vld [vmem:[%s1628_s26 + $0x11] sm:$0xff]  ;;  %v437_v13 = vld [vmem:[%s1628_s26 + $0x1] sm:$0xff] }
  0x18   : > { %v322_v14 = vld [vmem:[%s1647_s30] sm:$0xff]  ;;  %v1700_v15 = vld [vmem:[%s1628_s26 + $0x31] sm:$0xff] }
  0x19   : > { %331 = vst.msk [vmem:[#allocation2] sm:$0xff] %vm330_vm0, %v322_v14  ;;  %v1703_v16 = vld [vmem:[%s1628_s26 + $0x21] sm:$0xff]  ;;  %v1716_v17 = vld [vmem:[%s1709_s11 + $0x10] sm:$0xff] }
  0x1a   : > { %406 = vrot.lane.b32.xlu1 %v1654_v4, %s1562_s7  ;;  %v486_v18 = vld [vmem:[%s1709_s11] sm:$0xff]  ;;  %v1723_v19 = vld [vmem:[%s1709_s11 + $0x30] sm:$0xff] }
  0x1b   : > { %404 = vrot.lane.b32.xlu0 %v388_v5, %s1562_s7  ;;  %v1726_v20 = vld [vmem:[%s1709_s11 + $0x20] sm:$0xff]  ;;  %v1739_v21 = vld [vmem:[%s1732_s15 + $0x10] sm:$0xff] }
  0x1c   : > { %v535_v22 = vld [vmem:[%s1732_s15] sm:$0xff]  ;;  %v1746_v23 = vld [vmem:[%s1732_s15 + $0x30] sm:$0xff] }
  0x1d   : > { %v1749_v24 = vld [vmem:[%s1732_s15 + $0x20] sm:$0xff]  ;;  %v1756_v25 = vld [vmem:[%s1709_s11 + $0x11] sm:$0xff] }
  0x1e   : > { %410 = vrot.lane.b32.xlu1 %v1661_v6, %s1562_s7  ;;  %v584_v26 = vld [vmem:[%s1709_s11 + $0x1] sm:$0xff]  ;;  %v1763_v27 = vld [vmem:[%s1709_s11 + $0x31] sm:$0xff] }
  0x1f   : > { %408 = vrot.lane.b32.xlu0 %v1664_v7, %s1562_s7  ;;  %v1766_v28 = vld [vmem:[%s1709_s11 + $0x21] sm:$0xff]  ;;  %v1772_v30 = vld [vmem:[%s1647_s30 + $0x50] sm:$0xff] }
  0x20   : > { %v1769_v29 = vld [vmem:[%s1647_s30 + $0x60] sm:$0xff]  ;;  %336 = vst.msk [vmem:[#allocation2 + $0x28] sm:$0xff] %vm330_vm0, %v1772_v30  ;;  %v1783_v31 = vld [vmem:[%s1732_s15 + $0x11] sm:$0xff] }
  0x21   : > { %337 = vst.msk [vmem:[#allocation2 + $0x30] sm:$0xff] %vm330_vm0, %v1769_v29  ;;  %v633_v32 = vld [vmem:[%s1732_s15 + $0x1] sm:$0xff]  ;;  %v1790_v33 = vld [vmem:[%s1732_s15 + $0x31] sm:$0xff] }
  0x22   : > { %455 = vrot.lane.b32.xlu1 %v1691_v12, %s1563_s8  ;;  %v1793_v34 = vld [vmem:[%s1732_s15 + $0x21] sm:$0xff]  ;;  %v1796_v35 = vld [vmem:[%s1647_s30 + $0x70] sm:$0xff] }
  0x23   : > { %453 = vrot.lane.b32.xlu0 %v437_v13, %s1563_s8  ;;  %338 = vst.msk [vmem:[#allocation2 + $0x38] sm:$0xff] %vm330_vm0, %v1796_v35  ;;  %v1809_v36 = vld [vmem:[%s1628_s26 + $0x50] sm:$0xff]  ;;  %v343_v37 = vld [vmem:[%s1628_s26 + $0x40] sm:$0xff]  ;;  %vm1122_vm0 = vcmask 523264  }
  0x24   : > { %v1824_v38 = vld [vmem:[%s1628_s26 + $0x70] sm:$0xff]  ;;  %v1827_v39 = vld [vmem:[%s1628_s26 + $0x60] sm:$0xff] }
  0x25   : > { %v1834_v40 = vld [vmem:[%s1647_s30 + $0x51] sm:$0xff]  ;;  %v392_v41 = vld [vmem:[%s1647_s30 + $0x41] sm:$0xff] }
  0x26   : > { %459 = vrot.lane.b32.xlu1 %v1700_v15, %s1563_s8  ;;  %v1848_v42 = vld [vmem:[%s1647_s30 + $0x71] sm:$0xff]  ;;  %v1851_v43 = vld [vmem:[%s1647_s30 + $0x61] sm:$0xff] }
  0x27   : > { %457 = vrot.lane.b32.xlu0 %v1703_v16, %s1563_s8  ;;  %v1858_v44 = vld [vmem:[%s1628_s26 + $0x51] sm:$0xff]  ;;  %v441_v45 = vld [vmem:[%s1628_s26 + $0x41] sm:$0xff] }
  0x28   : > { %v1872_v46 = vld [vmem:[%s1628_s26 + $0x71] sm:$0xff]  ;;  %v1875_v47 = vld [vmem:[%s1628_s26 + $0x61] sm:$0xff] }
  0x29   : > { %v1882_v48 = vld [vmem:[%s1709_s11 + $0x50] sm:$0xff]  ;;  %v490_v49 = vld [vmem:[%s1709_s11 + $0x40] sm:$0xff] }
  0x2a   : > { %504 = vrot.lane.b32.xlu1 %v1716_v17, %s1564_s12  ;;  %v1898_v52 = vld [vmem:[%s1709_s11 + $0x70] sm:$0xff]  ;;  %v1901_v53 = vld [vmem:[%s1709_s11 + $0x60] sm:$0xff] }
  0x2b   : > { %502 = vrot.lane.b32.xlu0 %v486_v18, %s1564_s12  ;;  %v1910_v56 = vld [vmem:[%s1732_s15 + $0x50] sm:$0xff]  ;;  %v539_v57 = vld [vmem:[%s1732_s15 + $0x40] sm:$0xff] }
  0x2c   : > { %v1933_v1 = vld [vmem:[%s1732_s15 + $0x60] sm:$0xff] }
  0x2d   : > { %v588_v5 = vld [vmem:[%s1709_s11 + $0x41] sm:$0xff] }
  0x2e   : > { %508 = vrot.lane.b32.xlu1 %v1723_v19, %s1564_s12  ;;  %v1965_v13 = vld [vmem:[%s1709_s11 + $0x61] sm:$0xff] }
  0x2f   : > { %506 = vrot.lane.b32.xlu0 %v1726_v20, %s1564_s12 }
  0x32   : > { %553 = vrot.lane.b32.xlu1 %v1739_v21, %s1565_s16 }
  0x33   : > { %551 = vrot.lane.b32.xlu0 %v535_v22, %s1565_s16 }
  0x36   : > { %557 = vrot.lane.b32.xlu1 %v1746_v23, %s1565_s16 }
  0x37   : > { %555 = vrot.lane.b32.xlu0 %v1749_v24, %s1565_s16 }
  0x3a   : > { %602 = vrot.lane.b32.xlu1 %v1756_v25, %s1566_s17 }
  0x3b   : > { %600 = vrot.lane.b32.xlu0 %v584_v26, %s1566_s17  ;;  %v1551_v26 = vld [vmem:[%s2212_s4 + $0x10] sm:$0xff]  }
  0x3e   : > { %606 = vrot.lane.b32.xlu1 %v1763_v27, %s1566_s17 }
  0x3f   : > { %604 = vrot.lane.b32.xlu0 %v1766_v28, %s1566_s17 }
  0x42   : > { %651 = vrot.lane.b32.xlu1 %v1783_v31, %s1567_s18 }
  0x43   : > { %649 = vrot.lane.b32.xlu0 %v633_v32, %s1567_s18 }
  0x46   : > { %655 = vrot.lane.b32.xlu1 %v1790_v33, %s1567_s18 }
  0x47   : > { %653 = vrot.lane.b32.xlu0 %v1793_v34, %s1567_s18 }
  0x4a   : > { %701 = vrot.lane.b32.xlu1 %v1667_v8, %s1568_s19 }
  0x4b   : > { %699 = vrot.lane.b32.xlu0 %v1670_v9, %s1568_s19 }
  0x4e   : > { %365 = vrot.lane.b32.xlu1 %v1809_v36, %s1561_s27 }
  0x4f   : > { %363 = vrot.lane.b32.xlu0 %v343_v37, %s1561_s27 }
  0x52   : > { %705 = vrot.lane.b32.xlu1 %v1673_v10, %s1568_s19 }
  0x53   : > { %703 = vrot.lane.b32.xlu0 %v1680_v11, %s1568_s19 }
  0x56   : > { %751 = vrot.lane.b32.xlu1 %v1631_v0, %s1569_s20  ;;  %v1930_v0 = vld [vmem:[%s1732_s15 + $0x70] sm:$0xff] }
  0x57   : > { %749 = vrot.lane.b32.xlu0 %v1641_v3, %s1569_s20 }
  0x5a   : > { %369 = vrot.lane.b32.xlu1 %v1824_v38, %s1561_s27 }
  0x5b   : > { %367 = vrot.lane.b32.xlu0 %v1827_v39, %s1561_s27  ;;  %s1573_s27 = smov 52  }
  0x5e   : > { %414 = vrot.lane.b32.xlu1 %v1834_v40, %s1562_s7 }
  0x5f   : > { %412 = vrot.lane.b32.xlu0 %v392_v41, %s1562_s7 }
  0x62   : > { %755 = vrot.lane.b32.xlu1 %v343_v37, %s1569_s20 }
  0x63   : > { %753 = vrot.lane.b32.xlu0 %v1638_v2, %s1569_s20 }
  0x66   : > { %800 = vrot.lane.b32.xlu1 %v1664_v7, %s1570_s23 }
  0x67   : > { %798 = vrot.lane.b32.xlu0 %v1654_v4, %s1570_s23  ;;  %v1942_v4 = vld [vmem:[%s1709_s11 + $0x51] sm:$0xff] }
  0x6a   : > { %418 = vrot.lane.b32.xlu1 %v1848_v42, %s1562_s7 }
  0x6b   : > { %416 = vrot.lane.b32.xlu0 %v1851_v43, %s1562_s7 }
  0x6e   : > { %463 = vrot.lane.b32.xlu1 %v1858_v44, %s1563_s8 }
  0x6f   : > { %461 = vrot.lane.b32.xlu0 %v441_v45, %s1563_s8 }
  0x72   : > { %804 = vrot.lane.b32.xlu1 %v392_v41, %s1570_s23 }
  0x73   : > { %802 = vrot.lane.b32.xlu0 %v1661_v6, %s1570_s23 }
  0x76   : > { %849 = vrot.lane.b32.xlu1 %v1703_v16, %s1571_s24  ;;  %v1974_v16 = vld [vmem:[%s1732_s15 + $0x51] sm:$0xff] }
  0x77   : > { %847 = vrot.lane.b32.xlu0 %v1691_v12, %s1571_s24  ;;  %v1962_v12 = vld [vmem:[%s1709_s11 + $0x71] sm:$0xff] }
  0x7a   : > { %467 = vrot.lane.b32.xlu1 %v1872_v46, %s1563_s8 }
  0x7b   : > { %465 = vrot.lane.b32.xlu0 %v1875_v47, %s1563_s8 }
  0x7e   : > { %512 = vrot.lane.b32.xlu1 %v1882_v48, %s1564_s12 }
  0x7f   : > { %510 = vrot.lane.b32.xlu0 %v490_v49, %s1564_s12 }
  0x82   : > { %853 = vrot.lane.b32.xlu1 %v441_v45, %s1571_s24 }
  0x83   : > { %851 = vrot.lane.b32.xlu0 %v1700_v15, %s1571_s24 }
  0x84   : > { %v360_v50 = vpop.permute.xlu1 %359 }
  0x85   : > { %v356_v51 = vpop.permute.xlu0 %355  ;;  %382 = vst.msk [vmem:[#allocation2 + $0x10] sm:$0xff] %vm379_vm1, %v360_v50  ;;  %v1425_v50 = vld [vmem:[%s1647_s30 + $0x80] sm:$0xff] }
  0x86   : > { %380 = vst.msk [vmem:[#allocation2] sm:$0xff] %vm379_vm1, %v356_v51  ;;  %899 = vrot.lane.b32.xlu1 %v1726_v20, %s1572_s25  ;;  %v1549_v20 = vld [vmem:[%s2212_s4] sm:$0xff]  }
  0x87   : > { %897 = vrot.lane.b32.xlu0 %v1716_v17, %s1572_s25  ;;  %v637_v17 = vld [vmem:[%s1732_s15 + $0x41] sm:$0xff]  ;;  %1500 = vmatprep.subr.bf16.mxu0 %v1549_v20 }
  0x88   : > { %v362_v54 = vpop.permute.xlu1 %361  ;;  %1516 = vmatprep.subr.bf16.mxu1 %v1549_v20  ;;  %1501 = vmatpush3.bf16.msra.mxu0 %v1549_v20 }
  0x89   : > { %v358_v55 = vpop.permute.xlu0 %357  ;;  %383 = vst.msk [vmem:[#allocation2 + $0x18] sm:$0xff] %vm379_vm1, %v362_v54  ;;  %1520 = vmatpush3.bf16.msra.mxu1 %v1549_v20 }
  0x8a   : > { %381 = vst.msk [vmem:[#allocation2 + $0x8] sm:$0xff] %vm379_vm1, %v358_v55  ;;  %516 = vrot.lane.b32.xlu1 %v1898_v52, %s1564_s12 }
  0x8b   : > { %514 = vrot.lane.b32.xlu0 %v1901_v53, %s1564_s12 }
  0x8c   : > { %v407_v58 = vpop.permute.xlu1 %406 }
  0x8d   : > { %v405_v59 = vpop.permute.xlu0 %404  ;;  %430 = vst.msk [vmem:[#allocation2 + $0x8] sm:$0xff] %vm428_vm2, %v407_v58 }
  0x8e   : > { %429 = vst.msk [vmem:[#allocation2] sm:$0xff] %vm428_vm2, %v405_v59  ;;  %561 = vrot.lane.b32.xlu1 %v1910_v56, %s1565_s16 }
  0x8f   : > { %559 = vrot.lane.b32.xlu0 %v539_v57, %s1565_s16 }
  0x90   : > { %v411_v60 = vpop.permute.xlu1 %410 }
  0x91   : > { %v409_v61 = vpop.permute.xlu0 %408  ;;  %432 = vst.msk [vmem:[#allocation2 + $0x18] sm:$0xff] %vm428_vm2, %v411_v60 }
  0x92   : > { %431 = vst.msk [vmem:[#allocation2 + $0x10] sm:$0xff] %vm428_vm2, %v409_v61  ;;  %903 = vrot.lane.b32.xlu1 %v490_v49, %s1572_s25 }
  0x93   : > { %901 = vrot.lane.b32.xlu0 %v1723_v19, %s1572_s25 }
  0x94   : > { %v456_v62 = vpop.permute.xlu1 %455 }
  0x95   : > { %v454_v63 = vpop.permute.xlu0 %453  ;;  %479 = vst.msk [vmem:[#allocation2 + $0x8] sm:$0xff] %vm477_vm3, %v456_v62 }
  0x96   : > { %478 = vst.msk [vmem:[#allocation2] sm:$0xff] %vm477_vm3, %v454_v63  ;;  %949 = vrot.lane.b32.xlu1 %v1749_v24, %s1573_s27 }
  0x97   : > { %947 = vrot.lane.b32.xlu0 %v1739_v21, %s1573_s27 }
  0x98   : > { %v460_v2 = vpop.permute.xlu1 %459 }
  0x99   : > { %v458_v3 = vpop.permute.xlu0 %457  ;;  %481 = vst.msk [vmem:[#allocation2 + $0x18] sm:$0xff] %vm477_vm3, %v460_v2 }
  0x9a   : > { %480 = vst.msk [vmem:[#allocation2 + $0x10] sm:$0xff] %vm477_vm3, %v458_v3  ;;  %565 = vrot.lane.b32.xlu1 %v1930_v0, %s1565_s16 }
  0x9b   : > { %563 = vrot.lane.b32.xlu0 %v1933_v1, %s1565_s16 }
  0x9c   : > { %v505_v6 = vpop.permute.xlu1 %504 }
  0x9d   : > { %v503_v7 = vpop.permute.xlu0 %502  ;;  %528 = vst.msk [vmem:[#allocation2 + $0x8] sm:$0xff] %vm526_vm4, %v505_v6 }
  0x9e   : > { %527 = vst.msk [vmem:[#allocation2] sm:$0xff] %vm526_vm4, %v503_v7  ;;  %610 = vrot.lane.b32.xlu1 %v1942_v4, %s1566_s17 }
  0x9f   : > { %608 = vrot.lane.b32.xlu0 %v588_v5, %s1566_s17 }
  0xa0   : > { %v509_v8 = vpop.permute.xlu1 %508 }
  0xa1   : > { %v507_v9 = vpop.permute.xlu0 %506  ;;  %530 = vst.msk [vmem:[#allocation2 + $0x18] sm:$0xff] %vm526_vm4, %v509_v8 }
  0xa2   : > { %529 = vst.msk [vmem:[#allocation2 + $0x10] sm:$0xff] %vm526_vm4, %v507_v9  ;;  %953 = vrot.lane.b32.xlu1 %v539_v57, %s1573_s27 }
  0xa3   : > { %951 = vrot.lane.b32.xlu0 %v1746_v23, %s1573_s27  ;;  %v1550_v23 = vld [vmem:[%s2212_s4 + $0x8] sm:$0xff]  }
  0xa4   : > { %v554_v10 = vpop.permute.xlu1 %553  ;;  %1502 = vmatprep.subr.bf16.mxu0 %v1550_v23  ;;  %1517 = vmatprep.subr.bf16.mxu1 %v1550_v23 }
  0xa5   : > { %v552_v11 = vpop.permute.xlu0 %551  ;;  %577 = vst.msk [vmem:[#allocation2 + $0x8] sm:$0xff] %vm575_vm5, %v554_v10  ;;  %1503 = vmatpush3.bf16.msra.mxu0 %v1550_v23  ;;  %1521 = vmatpush3.bf16.msra.mxu1 %v1550_v23 }
  0xa6   : > { %576 = vst.msk [vmem:[#allocation2] sm:$0xff] %vm575_vm5, %v552_v11  ;;  %998 = vrot.lane.b32.xlu1 %v1766_v28, %s1574_s28  ;;  %v2006_v28 = vld [vmem:[%s1732_s15 + $0x61] sm:$0xff]  ;;  %1504 = vmatprep.subr.bf16.mxu0 %v1551_v26 }
  0xa7   : > { %996 = vrot.lane.b32.xlu0 %v1756_v25, %s1574_s28  ;;  %1518 = vmatprep.subr.bf16.mxu1 %v1551_v26 }
  0xa8   : > { %v558_v14 = vpop.permute.xlu1 %557 }
  0xa9   : > { %v556_v15 = vpop.permute.xlu0 %555  ;;  %579 = vst.msk [vmem:[#allocation2 + $0x18] sm:$0xff] %vm575_vm5, %v558_v14  ;;  %1505 = vmatpush3.bf16.msra.mxu0 %v1551_v26  ;;  %1522 = vmatpush3.bf16.msra.mxu1 %v1551_v26 }
  0xaa   : > { %578 = vst.msk [vmem:[#allocation2 + $0x10] sm:$0xff] %vm575_vm5, %v556_v15  ;;  %614 = vrot.lane.b32.xlu1 %v1962_v12, %s1566_s17 }
  0xab   : > { %612 = vrot.lane.b32.xlu0 %v1965_v13, %s1566_s17  ;;  %s1416_s17 = sshll.u32 %s2216_s22, 3 }
  0xac   : > { %v603_v18 = vpop.permute.xlu1 %602 }
  0xad   : > { %v601_v19 = vpop.permute.xlu0 %600  ;;  %626 = vst.msk [vmem:[#allocation2 + $0x8] sm:$0xff] %vm624_vm6, %v603_v18 }
  0xae   : > { %625 = vst.msk [vmem:[#allocation2] sm:$0xff] %vm624_vm6, %v601_v19  ;;  %659 = vrot.lane.b32.xlu1 %v1974_v16, %s1567_s18 }
  0xaf   : > { %657 = vrot.lane.b32.xlu0 %v637_v17, %s1567_s18 }
  0xb0   : > { %v607_v21 = vpop.permute.xlu1 %606 }
  0xb1   : > { %v605_v22 = vpop.permute.xlu0 %604  ;;  %628 = vst.msk [vmem:[#allocation2 + $0x18] sm:$0xff] %vm624_vm6, %v607_v21 }
  0xb2   : > { %627 = vst.msk [vmem:[#allocation2 + $0x10] sm:$0xff] %vm624_vm6, %v605_v22  ;;  %1002 = vrot.lane.b32.xlu1 %v588_v5, %s1574_s28 }
  0xb3   : > { %1000 = vrot.lane.b32.xlu0 %v1763_v27, %s1574_s28  ;;  %v2003_v27 = vld [vmem:[%s1732_s15 + $0x71] sm:$0xff] }
  0xb4   : > { %v652_v24 = vpop.permute.xlu1 %651 }
  0xb5   : > { %v650_v25 = vpop.permute.xlu0 %649  ;;  %675 = vst.msk [vmem:[#allocation2 + $0x8] sm:$0xff] %vm673_vm7, %v652_v24 }
  0xb6   : > { %674 = vst.msk [vmem:[#allocation2] sm:$0xff] %vm673_vm7, %v650_v25  ;;  %1047 = vrot.lane.b32.xlu1 %v1793_v34, %s1575_s13  ;;  %v1552_v34 = vld [vmem:[%s2212_s4 + $0x18] sm:$0xff]  }
  0xb7   : > { %1045 = vrot.lane.b32.xlu0 %v1783_v31, %s1575_s13  ;;  %1506 = vmatprep.subr.bf16.mxu0 %v1552_v34 }
  0xb8   : > { %v656_v32 = vpop.permute.xlu1 %655  ;;  %1519 = vmatprep.subr.bf16.mxu1 %v1552_v34  ;;  %1507 = vmatpush3.bf16.msra.mxu0 %v1552_v34 }
  0xb9   : > { %v654_v37 = vpop.permute.xlu0 %653  ;;  %677 = vst.msk [vmem:[#allocation2 + $0x18] sm:$0xff] %vm673_vm7, %v656_v32  ;;  %1523 = vmatpush3.bf16.msra.mxu1 %v1552_v34 }
  0xba   : > { %676 = vst.msk [vmem:[#allocation2 + $0x10] sm:$0xff] %vm673_vm7, %v654_v37  ;;  %663 = vrot.lane.b32.xlu1 %v2003_v27, %s1567_s18 }
  0xbb   : > { %661 = vrot.lane.b32.xlu0 %v2006_v28, %s1567_s18 }
  0xbc   : > { %v702_v31 = vpop.permute.xlu1 %701 }
  0xbd   : > { %v700_v41 = vpop.permute.xlu0 %699  ;;  %725 = vst.msk [vmem:[#allocation2 + $0x8] sm:$0xff] %vm723_vm8, %v702_v31 }
  0xbe   : > { %724 = vst.msk [vmem:[#allocation2] sm:$0xff] %vm723_vm8, %v700_v41  ;;  %709 = vrot.lane.b32.xlu1 %v1769_v29, %s1568_s19 }
  0xbf   : > { %707 = vrot.lane.b32.xlu0 %v1772_v30, %s1568_s19 }
  0xc0   : > { %v366_v45 = vpop.permute.xlu1 %365 }
  0xc1   : > { %v364_v49 = vpop.permute.xlu0 %363  ;;  %385 = vst.msk [vmem:[#allocation2 + $0x28] sm:$0xff] %vm379_vm1, %v366_v45 }
  0xc2   : > { %384 = vst.msk [vmem:[#allocation2 + $0x20] sm:$0xff] %vm379_vm1, %v364_v49  ;;  %1051 = vrot.lane.b32.xlu1 %v637_v17, %s1575_s13 }
  0xc3   : > { %1049 = vrot.lane.b32.xlu0 %v1790_v33, %s1575_s13  ;;  %v1433_v33 = vld [vmem:[%s1628_s26 + $0x80] sm:$0xff] }
  0xc4   : > { %v706_v51 = vpop.permute.xlu1 %705 }
  0xc5   : > { %v704_v54 = vpop.permute.xlu0 %703  ;;  %727 = vst.msk [vmem:[#allocation2 + $0x18] sm:$0xff] %vm723_vm8, %v706_v51 }
  0xc6   : > { %726 = vst.msk [vmem:[#allocation2 + $0x10] sm:$0xff] %vm723_vm8, %v704_v54  ;;  %713 = vrot.lane.b32.xlu1 %v1425_v50, %s1568_s19 }
  0xc7   : > { %711 = vrot.lane.b32.xlu0 %v1796_v35, %s1568_s19 }
  0xc8   : > { %v752_v29 = vpop.permute.xlu1 %751 }
  0xc9   : > { %v750_v30 = vpop.permute.xlu0 %749  ;;  %775 = vst.msk [vmem:[#allocation2 + $0x8] sm:$0xff] %vm773_vm9, %v752_v29 }
  0xca   : > { %774 = vst.msk [vmem:[#allocation2] sm:$0xff] %vm773_vm9, %v750_v30  ;;  %759 = vrot.lane.b32.xlu1 %v1827_v39, %s1569_s20 }
  0xcb   : > { %757 = vrot.lane.b32.xlu0 %v1809_v36, %s1569_s20  ;;  %v1441_v36 = vld [vmem:[%s1647_s30 + $0x81] sm:$0xff] }
  0xcc   : > { %v370_v55 = vpop.permute.xlu1 %369 }
  0xcd   : > { %v368_v57 = vpop.permute.xlu0 %367  ;;  %387 = vst.msk [vmem:[#allocation2 + $0x38] sm:$0xff] %vm379_vm1, %v370_v55 }
  0xce   : > { %386 = vst.msk [vmem:[#allocation2 + $0x30] sm:$0xff] %vm379_vm1, %v368_v57  ;;  %763 = vrot.lane.b32.xlu1 %v1433_v33, %s1569_s20  ;;  %vm1200_vm1 = vcmask 64512  }
  0xcf   : > { %761 = vrot.lane.b32.xlu0 %v1824_v38, %s1569_s20  ;;  %s316_s20 = scalar_lea.vmem %s2213_s5, %s1416_s17 }
  0xd0   : > { %v415_v35 = vpop.permute.xlu1 %414 }
  0xd1   : > { %v413_v58 = vpop.permute.xlu0 %412  ;;  %434 = vst.msk [vmem:[#allocation2 + $0x28] sm:$0xff] %vm428_vm2, %v415_v35 }
  0xd2   : > { %433 = vst.msk [vmem:[#allocation2 + $0x20] sm:$0xff] %vm428_vm2, %v413_v58  ;;  %808 = vrot.lane.b32.xlu1 %v1851_v43, %s1570_s23 }
  0xd3   : > { %806 = vrot.lane.b32.xlu0 %v1834_v40, %s1570_s23  ;;  %v1449_v40 = vld [vmem:[%s1628_s26 + $0x81] sm:$0xff]  ;;  %s1417_s26 = sshll.u32 %s2216_s22, 1 }
  0xd4   : > { %v756_v39 = vpop.permute.xlu1 %755 }
  0xd5   : > { %v754_v59 = vpop.permute.xlu0 %753  ;;  %777 = vst.msk [vmem:[#allocation2 + $0x18] sm:$0xff] %vm773_vm9, %v756_v39 }
  0xd6   : > { %776 = vst.msk [vmem:[#allocation2 + $0x10] sm:$0xff] %vm773_vm9, %v754_v59  ;;  %812 = vrot.lane.b32.xlu1 %v1441_v36, %s1570_s23 }
  0xd7   : > { %810 = vrot.lane.b32.xlu0 %v1848_v42, %s1570_s23 }
  0xd8   : > { %v801_v38 = vpop.permute.xlu1 %800 }
  0xd9   : > { %v799_v60 = vpop.permute.xlu0 %798  ;;  %824 = vst.msk [vmem:[#allocation2 + $0x8] sm:$0xff] %vm822_vm10, %v801_v38 }
  0xda   : > { %823 = vst.msk [vmem:[#allocation2] sm:$0xff] %vm822_vm10, %v799_v60  ;;  %857 = vrot.lane.b32.xlu1 %v1875_v47, %s1571_s24 }
  0xdb   : > { %855 = vrot.lane.b32.xlu0 %v1858_v44, %s1571_s24  ;;  %v1457_v44 = vld [vmem:[%s1709_s11 + $0x80] sm:$0xff] }
  0xdc   : > { %v419_v43 = vpop.permute.xlu1 %418 }
  0xdd   : > { %v417_v61 = vpop.permute.xlu0 %416  ;;  %436 = vst.msk [vmem:[#allocation2 + $0x38] sm:$0xff] %vm428_vm2, %v419_v43 }
  0xde   : > { %435 = vst.msk [vmem:[#allocation2 + $0x30] sm:$0xff] %vm428_vm2, %v417_v61  ;;  %861 = vrot.lane.b32.xlu1 %v1449_v40, %s1571_s24  ;;  %vm1222_vm2 = vcmask 57344  }
  0xdf   : > { %859 = vrot.lane.b32.xlu0 %v1872_v46, %s1571_s24 }
  0xe0   : > { %v464_v42 = vpop.permute.xlu1 %463 }
  0xe1   : > { %v462_v62 = vpop.permute.xlu0 %461  ;;  %483 = vst.msk [vmem:[#allocation2 + $0x28] sm:$0xff] %vm477_vm3, %v464_v42 }
  0xe2   : > { %482 = vst.msk [vmem:[#allocation2 + $0x20] sm:$0xff] %vm477_vm3, %v462_v62  ;;  %907 = vrot.lane.b32.xlu1 %v1901_v53, %s1572_s25 }
  0xe3   : > { %905 = vrot.lane.b32.xlu0 %v1882_v48, %s1572_s25  ;;  %v1465_v48 = vld [vmem:[%s1732_s15 + $0x80] sm:$0xff] }
  0xe4   : > { %v805_v47 = vpop.permute.xlu1 %804 }
  0xe5   : > { %v803_v63 = vpop.permute.xlu0 %802  ;;  %826 = vst.msk [vmem:[#allocation2 + $0x18] sm:$0xff] %vm822_vm10, %v805_v47 }
  0xe6   : > { %825 = vst.msk [vmem:[#allocation2 + $0x10] sm:$0xff] %vm822_vm10, %v803_v63  ;;  %911 = vrot.lane.b32.xlu1 %v1457_v44, %s1572_s25 }
  0xe7   : > { %909 = vrot.lane.b32.xlu0 %v1898_v52, %s1572_s25 }
  0xe8   : > { %v850_v46 = vpop.permute.xlu1 %849 }
  0xe9   : > { %v848_v2 = vpop.permute.xlu0 %847  ;;  %873 = vst.msk [vmem:[#allocation2 + $0x8] sm:$0xff] %vm871_vm11, %v850_v46 }
  0xea   : > { %872 = vst.msk [vmem:[#allocation2] sm:$0xff] %vm871_vm11, %v848_v2  ;;  %957 = vrot.lane.b32.xlu1 %v1933_v1, %s1573_s27 }
  0xeb   : > { %955 = vrot.lane.b32.xlu0 %v1910_v56, %s1573_s27  ;;  %v1473_v56 = vld [vmem:[%s1709_s11 + $0x81] sm:$0xff] }
  0xec   : > { %v468_v53 = vpop.permute.xlu1 %467 }
  0xed   : > { %v466_v3 = vpop.permute.xlu0 %465  ;;  %485 = vst.msk [vmem:[#allocation2 + $0x38] sm:$0xff] %vm477_vm3, %v468_v53 }
  0xee   : > { %484 = vst.msk [vmem:[#allocation2 + $0x30] sm:$0xff] %vm477_vm3, %v466_v3  ;;  %961 = vrot.lane.b32.xlu1 %v1465_v48, %s1573_s27 }
  0xef   : > { %959 = vrot.lane.b32.xlu0 %v1930_v0, %s1573_s27 }
  0xf0   : > { %v513_v52 = vpop.permute.xlu1 %512 }
  0xf1   : > { %v511_v5 = vpop.permute.xlu0 %510  ;;  %532 = vst.msk [vmem:[#allocation2 + $0x28] sm:$0xff] %vm526_vm4, %v513_v52 }
  0xf2   : > { %531 = vst.msk [vmem:[#allocation2 + $0x20] sm:$0xff] %vm526_vm4, %v511_v5  ;;  %1006 = vrot.lane.b32.xlu1 %v1965_v13, %s1574_s28 }
  0xf3   : > { %1004 = vrot.lane.b32.xlu0 %v1942_v4, %s1574_s28  ;;  %v1481_v4 = vld [vmem:[%s1732_s15 + $0x81] sm:$0xff]  ;;  %s320_s15 = scalar_lea.vmem %s2214_s6, %s1417_s26 }
  0xf4   : > { %v854_v1 = vpop.permute.xlu1 %853 }
  0xf5   : > { %v852_v6 = vpop.permute.xlu0 %851  ;;  %875 = vst.msk [vmem:[#allocation2 + $0x18] sm:$0xff] %vm871_vm11, %v854_v1 }
  0xf6   : > { %874 = vst.msk [vmem:[#allocation2 + $0x10] sm:$0xff] %vm871_vm11, %v852_v6  ;;  %1010 = vrot.lane.b32.xlu1 %v1473_v56, %s1574_s28 }
  0xf7   : > { %1008 = vrot.lane.b32.xlu0 %v1962_v12, %s1574_s28 }
  0xf8   : > { %v900_v0 = vpop.permute.xlu1 %899 }
  0xf9   : > { %v898_v7 = vpop.permute.xlu0 %897  ;;  %923 = vst.msk [vmem:[#allocation2 + $0x8] sm:$0xff] %vm921_vm12, %v900_v0 }
  0xfa   : > { %922 = vst.msk [vmem:[#allocation2] sm:$0xff] %vm921_vm12, %v898_v7  ;;  %1055 = vrot.lane.b32.xlu1 %v2006_v28, %s1575_s13 }
  0xfb   : > { %1053 = vrot.lane.b32.xlu0 %v1974_v16, %s1575_s13 }
  0xfc   : > { %v517_v8 = vpop.permute.xlu1 %516 }
  0xfd   : > { %v515_v9 = vpop.permute.xlu0 %514  ;;  %534 = vst.msk [vmem:[#allocation2 + $0x38] sm:$0xff] %vm526_vm4, %v517_v8 }
  0xfe   : > { %533 = vst.msk [vmem:[#allocation2 + $0x30] sm:$0xff] %vm526_vm4, %v515_v9  ;;  %1059 = vrot.lane.b32.xlu1 %v1481_v4, %s1575_s13 }
  0xff   : > { %1057 = vrot.lane.b32.xlu0 %v2003_v27, %s1575_s13 }
 0x100   : > { %v562_v10 = vpop.permute.xlu1 %561 }
 0x101   : > { %v560_v11 = vpop.permute.xlu0 %559  ;;  %581 = vst.msk [vmem:[#allocation2 + $0x28] sm:$0xff] %vm575_vm5, %v562_v10 }
 0x102   : > { %580 = vst.msk [vmem:[#allocation2 + $0x20] sm:$0xff] %vm575_vm5, %v560_v11 }
 0x104   : > { %v904_v12 = vpop.permute.xlu1 %903 }
 0x105   : > { %v902_v13 = vpop.permute.xlu0 %901  ;;  %925 = vst.msk [vmem:[#allocation2 + $0x18] sm:$0xff] %vm921_vm12, %v904_v12 }
 0x106   : > { %924 = vst.msk [vmem:[#allocation2 + $0x10] sm:$0xff] %vm921_vm12, %v902_v13 }
 0x108   : > { %v950_v14 = vpop.permute.xlu1 %949 }
 0x109   : > { %v948_v15 = vpop.permute.xlu0 %947  ;;  %973 = vst.msk [vmem:[#allocation2 + $0x8] sm:$0xff] %vm971_vm13, %v950_v14 }
 0x10a   : > { %972 = vst.msk [vmem:[#allocation2] sm:$0xff] %vm971_vm13, %v948_v15 }
 0x10c   : > { %v566_v16 = vpop.permute.xlu1 %565 }
 0x10d   : > { %v564_v17 = vpop.permute.xlu0 %563  ;;  %583 = vst.msk [vmem:[#allocation2 + $0x38] sm:$0xff] %vm575_vm5, %v566_v16 }
 0x10e   : > { %582 = vst.msk [vmem:[#allocation2 + $0x30] sm:$0xff] %vm575_vm5, %v564_v17 }
 0x110   : > { %v611_v18 = vpop.permute.xlu1 %610 }
 0x111   : > { %v609_v19 = vpop.permute.xlu0 %608  ;;  %630 = vst.msk [vmem:[#allocation2 + $0x28] sm:$0xff] %vm624_vm6, %v611_v18 }
 0x112   : > { %629 = vst.msk [vmem:[#allocation2 + $0x20] sm:$0xff] %vm624_vm6, %v609_v19 }
 0x114   : > { %v954_v20 = vpop.permute.xlu1 %953 }
 0x115   : > { %v952_v21 = vpop.permute.xlu0 %951  ;;  %975 = vst.msk [vmem:[#allocation2 + $0x18] sm:$0xff] %vm971_vm13, %v954_v20 }
 0x116   : > { %974 = vst.msk [vmem:[#allocation2 + $0x10] sm:$0xff] %vm971_vm13, %v952_v21 }
 0x118   : > { %v999_v22 = vpop.permute.xlu1 %998 }
 0x119   : > { %v997_v23 = vpop.permute.xlu0 %996  ;;  %1022 = vst.msk [vmem:[#allocation2 + $0x8] sm:$0xff] %vm1020_vm14, %v999_v22 }
 0x11a   : > { %1021 = vst.msk [vmem:[#allocation2] sm:$0xff] %vm1020_vm14, %v997_v23 }
 0x11c   : > { %v615_v24 = vpop.permute.xlu1 %614 }
 0x11d   : > { %v613_v25 = vpop.permute.xlu0 %612  ;;  %632 = vst.msk [vmem:[#allocation2 + $0x38] sm:$0xff] %vm624_vm6, %v615_v24 }
 0x11e   : > { %631 = vst.msk [vmem:[#allocation2 + $0x30] sm:$0xff] %vm624_vm6, %v613_v25 }
 0x120   : > { %v660_v26 = vpop.permute.xlu1 %659 }
 0x121   : > { %v658_v27 = vpop.permute.xlu0 %657  ;;  %679 = vst.msk [vmem:[#allocation2 + $0x28] sm:$0xff] %vm673_vm7, %v660_v26 }
 0x122   : > { %678 = vst.msk [vmem:[#allocation2 + $0x20] sm:$0xff] %vm673_vm7, %v658_v27 }
 0x124   : > { %v1003_v28 = vpop.permute.xlu1 %1002 }
 0x125   : > { %v1001_v32 = vpop.permute.xlu0 %1000  ;;  %1024 = vst.msk [vmem:[#allocation2 + $0x18] sm:$0xff] %vm1020_vm14, %v1003_v28 }
 0x126   : > { %1023 = vst.msk [vmem:[#allocation2 + $0x10] sm:$0xff] %vm1020_vm14, %v1001_v32 }
 0x128   : > { %v1048_v37 = vpop.permute.xlu1 %1047 }
 0x129   : > { %v1046_v34 = vpop.permute.xlu0 %1045  ;;  %1071 = vst.msk [vmem:[#allocation2 + $0x8] sm:$0xff] %vm1069_vm15, %v1048_v37 }
 0x12a   : > { %1070 = vst.msk [vmem:[#allocation2] sm:$0xff] %vm1069_vm15, %v1046_v34 }
 0x12c   : > { %v664_v31 = vpop.permute.xlu1 %663 }
 0x12d   : > { %v662_v41 = vpop.permute.xlu0 %661  ;;  %681 = vst.msk [vmem:[#allocation2 + $0x38] sm:$0xff] %vm673_vm7, %v664_v31 }
 0x12e   : > { %680 = vst.msk [vmem:[#allocation2 + $0x30] sm:$0xff] %vm673_vm7, %v662_v41 }
 0x130   : > { %v710_v45 = vpop.permute.xlu1 %709  ;;  %v1079_v51 = vld [vmem:[#allocation2 + $0x8] sm:$0xff] }
 0x131   : > { %v708_v49 = vpop.permute.xlu0 %707  ;;  %v1078_v50 = vld [vmem:[#allocation2] sm:$0xff]  ;;  %729 = vst.msk [vmem:[#allocation2 + $0x28] sm:$0xff] %vm723_vm8, %v710_v45 }
 0x132   : > { %728 = vst.msk [vmem:[#allocation2 + $0x20] sm:$0xff] %vm723_vm8, %v708_v49  ;;  %v1086_v54 = vpack.c.bf16 %v1079_v51, %v1078_v50 }
 0x134   : > { %1508 = vmatprep.mubr.msk.bf16.mxu0 %vm1122_vm0, %v1086_v54  ;;  %v1052_v29 = vpop.permute.xlu1 %1051 }
 0x135   : > { %v1050_v30 = vpop.permute.xlu0 %1049  ;;  %1073 = vst.msk [vmem:[#allocation2 + $0x18] sm:$0xff] %vm1069_vm15, %v1052_v29 }
 0x136   : > { %1072 = vst.msk [vmem:[#allocation2 + $0x10] sm:$0xff] %vm1069_vm15, %v1050_v30 }
 0x138   : > { %v714_v33 = vpop.permute.xlu1 %713 }
 0x139   : > { %v712_v55 = vpop.permute.xlu0 %711  ;;  %731 = vst.msk [vmem:[#allocation2 + $0x38] sm:$0xff] %vm723_vm8, %v714_v33 }
 0x13a   : > { %730 = vst.msk [vmem:[#allocation2 + $0x30] sm:$0xff] %vm723_vm8, %v712_v55 }
 0x13c   : > { %v760_v57 = vpop.permute.xlu1 %759  ;;  %v1081_v36 = vld [vmem:[#allocation2 + $0x18] sm:$0xff] }
 0x13d   : > { %v758_v35 = vpop.permute.xlu0 %757  ;;  %v1080_v58 = vld [vmem:[#allocation2 + $0x10] sm:$0xff]  ;;  %779 = vst.msk [vmem:[#allocation2 + $0x28] sm:$0xff] %vm773_vm9, %v760_v57 }
 0x13e   : > { %778 = vst.msk [vmem:[#allocation2 + $0x20] sm:$0xff] %vm773_vm9, %v758_v35  ;;  %v1087_v39 = vpack.c.bf16 %v1081_v36, %v1080_v58 }
 0x140   : > { %1509 = vmatmul.mubr.msk.bf16.vlgmr.msra.gmra.mrb[0].mxu0 %vm1122_vm0, %v1087_v39  ;;  %v764_v59 = vpop.permute.xlu1 %763 }
 0x141   : > { %v762_v38 = vpop.permute.xlu0 %761  ;;  %781 = vst.msk [vmem:[#allocation2 + $0x38] sm:$0xff] %vm773_vm9, %v764_v59 }
 0x142   : > { %780 = vst.msk [vmem:[#allocation2 + $0x30] sm:$0xff] %vm773_vm9, %v762_v38 }
 0x144   : > { %v809_v60 = vpop.permute.xlu1 %808 }
 0x145   : > { %v807_v40 = vpop.permute.xlu0 %806  ;;  %828 = vst.msk [vmem:[#allocation2 + $0x28] sm:$0xff] %vm822_vm10, %v809_v60 }
 0x146   : > { %827 = vst.msk [vmem:[#allocation2 + $0x20] sm:$0xff] %vm822_vm10, %v807_v40 }
 0x148   : > { %v813_v43 = vpop.permute.xlu1 %812 }
 0x149   : > { %v811_v61 = vpop.permute.xlu0 %810  ;;  %830 = vst.msk [vmem:[#allocation2 + $0x38] sm:$0xff] %vm822_vm10, %v813_v43 }
 0x14a   : > { %829 = vst.msk [vmem:[#allocation2 + $0x30] sm:$0xff] %vm822_vm10, %v811_v61 }
 0x14c   : > { %v858_v42 = vpop.permute.xlu1 %857 }
 0x14d   : > { %v856_v62 = vpop.permute.xlu0 %855  ;;  %877 = vst.msk [vmem:[#allocation2 + $0x28] sm:$0xff] %vm871_vm11, %v858_v42 }
 0x14e   : > { %876 = vst.msk [vmem:[#allocation2 + $0x20] sm:$0xff] %vm871_vm11, %v856_v62 }
 0x150   : > { %v862_v44 = vpop.permute.xlu1 %861 }
 0x151   : > { %v860_v47 = vpop.permute.xlu0 %859  ;;  %879 = vst.msk [vmem:[#allocation2 + $0x38] sm:$0xff] %vm871_vm11, %v862_v44 }
 0x152   : > { %878 = vst.msk [vmem:[#allocation2 + $0x30] sm:$0xff] %vm871_vm11, %v860_v47 }
 0x154   : > { %v908_v63 = vpop.permute.xlu1 %907 }
 0x155   : > { %v906_v46 = vpop.permute.xlu0 %905  ;;  %927 = vst.msk [vmem:[#allocation2 + $0x28] sm:$0xff] %vm921_vm12, %v908_v63 }
 0x156   : > { %926 = vst.msk [vmem:[#allocation2 + $0x20] sm:$0xff] %vm921_vm12, %v906_v46 }
 0x158   : > { %v912_v2 = vpop.permute.xlu1 %911 }
 0x159   : > { %v910_v48 = vpop.permute.xlu0 %909  ;;  %929 = vst.msk [vmem:[#allocation2 + $0x38] sm:$0xff] %vm921_vm12, %v912_v2 }
 0x15a   : > { %928 = vst.msk [vmem:[#allocation2 + $0x30] sm:$0xff] %vm921_vm12, %v910_v48 }
 0x15c   : > { %v958_v53 = vpop.permute.xlu1 %957 }
 0x15d   : > { %v956_v3 = vpop.permute.xlu0 %955  ;;  %977 = vst.msk [vmem:[#allocation2 + $0x28] sm:$0xff] %vm971_vm13, %v958_v53 }
 0x15e   : > { %976 = vst.msk [vmem:[#allocation2 + $0x20] sm:$0xff] %vm971_vm13, %v956_v3 }
 0x160   : > { %v962_v52 = vpop.permute.xlu1 %961 }
 0x161   : > { %v960_v5 = vpop.permute.xlu0 %959  ;;  %979 = vst.msk [vmem:[#allocation2 + $0x38] sm:$0xff] %vm971_vm13, %v962_v52 }
 0x162   : > { %978 = vst.msk [vmem:[#allocation2 + $0x30] sm:$0xff] %vm971_vm13, %v960_v5 }
 0x164   : > { %v1007_v56 = vpop.permute.xlu1 %1006 }
 0x165   : > { %v1005_v1 = vpop.permute.xlu0 %1004  ;;  %1026 = vst.msk [vmem:[#allocation2 + $0x28] sm:$0xff] %vm1020_vm14, %v1007_v56 }
 0x166   : > { %1025 = vst.msk [vmem:[#allocation2 + $0x20] sm:$0xff] %vm1020_vm14, %v1005_v1 }
 0x168   : > { %v1011_v6 = vpop.permute.xlu1 %1010 }
 0x169   : > { %v1009_v0 = vpop.permute.xlu0 %1008  ;;  %1028 = vst.msk [vmem:[#allocation2 + $0x38] sm:$0xff] %vm1020_vm14, %v1011_v6 }
 0x16a   : > { %1027 = vst.msk [vmem:[#allocation2 + $0x30] sm:$0xff] %vm1020_vm14, %v1009_v0 }
 0x16c   : > { %v1056_v7 = vpop.permute.xlu1 %1055 }
 0x16d   : > { %v1054_v4 = vpop.permute.xlu0 %1053  ;;  %1075 = vst.msk [vmem:[#allocation2 + $0x28] sm:$0xff] %vm1069_vm15, %v1056_v7 }
 0x16e   : > { %1074 = vst.msk [vmem:[#allocation2 + $0x20] sm:$0xff] %vm1069_vm15, %v1054_v4 }
 0x170   : > { %v1060_v8 = vpop.permute.xlu1 %1059 }
 0x171   : > { %v1058_v9 = vpop.permute.xlu0 %1057  ;;  %1077 = vst.msk [vmem:[#allocation2 + $0x38] sm:$0xff] %vm1069_vm15, %v1060_v8 }
 0x172   : > { %1076 = vst.msk [vmem:[#allocation2 + $0x30] sm:$0xff] %vm1069_vm15, %v1058_v9 }
 0x174   : > { %v1083_v11 = vld [vmem:[#allocation2 + $0x28] sm:$0xff] }
 0x175   : > { %v1082_v10 = vld [vmem:[#allocation2 + $0x20] sm:$0xff] }
 0x176   : > { %v1088_v12 = vpack.c.bf16 %v1083_v11, %v1082_v10 }
 0x178   : > { %1512 = vmatprep.mubr.msk.bf16.mxu1 %vm1122_vm0, %v1088_v12  ;;  %v1085_v14 = vld [vmem:[#allocation2 + $0x38] sm:$0xff] }
 0x179   : > { %v1084_v13 = vld [vmem:[#allocation2 + $0x30] sm:$0xff] }
 0x17a   : > { %v1089_v15 = vpack.c.bf16 %v1085_v14, %v1084_v13 }
 0x17c   : > { %1513 = vmatmul.mubr.msk.bf16.vlgmr.msra.gmra.mrb[0].mxu1 %vm1122_vm0, %v1089_v15 }
 0x213   : > { %v1510_v16 = vpop.f32.mrb[0].mxu0 }
 0x214   : > { %v1169_v17 = vpop.f32.mrb[1].mxu0  ;;  %v1226_v21 = vmul.f32 %v1510_v16, %v1510_v16  ;;  %v1204_v26 = vsel %vm1200_vm1, %v1510_v16, 0.0 }
 0x215   : > { %v1224_v18 = vmul.f32 %v1169_v17, %v1169_v17  ;;  %1254 = vxpose.xlu0.b32.start [1/8] (short) (narrow) %v1169_v17, 8  ;;  %v1511_v19 = vpop.f32.mrb[2].mxu0  ;;  %v1201_v22 = vsel %vm1200_vm1, %v1169_v17, 0.0 }
 0x216   : > { %v1172_v20 = vpop.f32.mrb[3].mxu0  ;;  %v1227_v28 = vmul.f32 %v1511_v19, %v1511_v19  ;;  %v1235_v31 = vsel %vm1200_vm1, %v1226_v21, 0.0  ;;  %v1206_v41 = vsel %vm1200_vm1, %v1511_v19, 0.0 }
 0x217   : > { %v1202_v23 = vsel %vm1200_vm1, %v1172_v20, 0.0  ;;  %v1225_v24 = vmul.f32 %v1172_v20, %v1172_v20  ;;  %v1232_v27 = vsel %vm1200_vm1, %v1224_v18, 0.0 }
 0x218   : > { %v1203_v25 = vadd.f32 %v1202_v23, %v1201_v22  ;;  %v1237_v50 = vsel %vm1200_vm1, %v1227_v28, 0.0 }
 0x219   : > { %v1233_v32 = vsel %vm1200_vm1, %v1225_v24, 0.0  ;;  %1255 = vxpose.xlu0.b32.cont [2/8] (short) (narrow) %v1172_v20, 8 }
 0x21a   : > { %v1205_v37 = vadd.f32 %v1204_v26, %v1203_v25  ;;  %v1234_v34 = vadd.f32 %v1233_v32, %v1232_v27 }
 0x21c   : > { %v1236_v45 = vadd.f32 %v1235_v31, %v1234_v34  ;;  %v1207_v49 = vadd.f32 %v1206_v41, %v1205_v37 }
 0x21d   : > { %1256 = vxpose.xlu0.b32.cont [3/8] (short) (narrow) %v1510_v16, 8 }
 0x21e   : > { %v1238_v51 = vadd.f32 %v1237_v50, %v1236_v45 }
 0x221   : > { %1257 = vxpose.xlu0.b32.cont [4/8] (short) (narrow) %v1511_v19, 8 }
 0x24f   : > { %v1514_v54 = vpop.f32.mrb[0].mxu1 }
 0x250   : > { %v1185_v29 = vpop.f32.mrb[1].mxu1  ;;  %v1230_v58 = vmul.f32 %v1514_v54, %v1514_v54  ;;  %v1212_v40 = vsel %vm1200_vm1, %v1514_v54, 0.0 }
 0x251   : > { %v1208_v30 = vsel %vm1200_vm1, %v1185_v29, 0.0  ;;  %v1228_v33 = vmul.f32 %v1185_v29, %v1185_v29  ;;  %v1515_v55 = vpop.f32.mrb[2].mxu1  ;;  %1258 = vxpose.xlu0.b32.cont [5/8] (short) (narrow) %v1185_v29, 8 }
 0x252   : > { %v1209_v57 = vadd.f32 %v1208_v30, %v1207_v49  ;;  %v1188_v35 = vpop.f32.mrb[3].mxu1  ;;  %v1231_v43 = vmul.f32 %v1515_v55, %v1515_v55  ;;  %v1243_v44 = vsel %vm1200_vm1, %v1230_v58, 0.0  ;;  %v1214_v47 = vsel %vm1200_vm1, %v1515_v55, 0.0 }
 0x253   : > { %v1239_v36 = vsel %vm1200_vm1, %v1228_v33, 0.0  ;;  %v1210_v39 = vsel %vm1200_vm1, %v1188_v35, 0.0  ;;  %v1229_v59 = vmul.f32 %v1188_v35, %v1188_v35 }
 0x254   : > { %v1240_v38 = vadd.f32 %v1239_v36, %v1238_v51  ;;  %v1211_v60 = vadd.f32 %v1210_v39, %v1209_v57  ;;  %v1245_v2 = vsel %vm1200_vm1, %v1231_v43, 0.0 }
 0x255   : > { %v1241_v61 = vsel %vm1200_vm1, %v1229_v59, 0.0  ;;  %1259 = vxpose.xlu0.b32.cont [6/8] (short) (narrow) %v1188_v35, 8 }
 0x256   : > { %v1213_v42 = vadd.f32 %v1212_v40, %v1211_v60  ;;  %v1242_v62 = vadd.f32 %v1241_v61, %v1240_v38 }
 0x258   : > { %v1215_v63 = vadd.f32 %v1214_v47, %v1213_v42  ;;  %v1244_v46 = vadd.f32 %v1243_v44, %v1242_v62 }
 0x259   : > { %1260 = vxpose.xlu0.b32.cont [7/8] (short) (narrow) %v1514_v54, 8 }
 0x25a   : > { %v1216_v48 = vrot.slane %v1215_v63, 4  ;;  %v1246_v53 = vadd.f32 %v1245_v2, %v1244_v46 }
 0x25c   : > { %v1217_v3 = vadd.f32 %v1216_v48, %v1215_v63  ;;  %v1247_v52 = vrot.slane %v1246_v53, 4 }
 0x25d   : > { %1261 = vxpose.xlu0.b32.end [8/8] (short) (narrow) %v1515_v55, 8 }
 0x25e   : > { %v1218_v5 = vrot.slane %v1217_v3, 2  ;;  %v1248_v56 = vadd.f32 %v1247_v52, %v1246_v53 }
 0x260   : > { %v1219_v1 = vadd.f32 %v1218_v5, %v1217_v3  ;;  %v1249_v6 = vrot.slane %v1248_v56, 2 }
 0x262   : > { %v1220_v0 = vrot.slane %v1219_v1, 1  ;;  %v1250_v7 = vadd.f32 %v1249_v6, %v1248_v56 }
 0x264   : > { %v1221_v4 = vadd.f32 %v1220_v0, %v1219_v1  ;;  %v1251_v8 = vrot.slane %v1250_v7, 1 }
 0x266   : > { %1223 = vst.msk [vmem:[%s320_s15] sm:$0x1] %vm1222_vm2, %v1221_v4  ;;  %v1252_v9 = vadd.f32 %v1251_v8, %v1250_v7 }
 0x268   : > { %1253 = vst.msk [vmem:[%s320_s15 + $0x1] sm:$0x1] %vm1222_vm2, %v1252_v9 }
 0x2c1   : > { %v1270_v10 = vpop.trf.xlu0 }
 0x2c2   : > { %1286 = vst.msk [vmem:[%s316_s20] sm:$0xff] %vm1122_vm0, %v1270_v10 }
 0x2c3 PF: > { %s17_s21 = sadd.s32 1, %s1559_s21  }
 0x2c4   : > { %p14_p4 = scmp.ge.s32.totalorder %s17_s21, 4  }
 0x2c6   :  { %16 = sbr.rel (!%p14_p4) target bundleno = 1 (0x1), region = 95 }

</bundles_post_ra>
